<compile_context>
chip_gen: v7x
topology: tpu7x:2x2x1
jax: 0.10.0
libtpu: 0.0.40
codegen_flags: <defaults>
</compile_context>

<pallas_src>
import functools

import jax
import jax.numpy as jnp
from jax.experimental import pallas as pl
from jax.experimental.pallas import tpu as pltpu

EPS = 1e-5      # BatchNorm1d default eps
NUM_LIN1 = 3    # ConfigurablePooling.lin1: 3 x (Linear -> BN -> ReLU -> Dropout)
NUM_LIN2 = 4    # ConfigurablePooling.lin2: 3 x (Linear -> BN -> ReLU -> Dropout) + Linear


def _round_up(x, m):
    return (x + m - 1) // m * m


def _vmem_spec():
    return pl.BlockSpec(memory_space=pltpu.MemorySpace.VMEM)


# ------------------------ single fused forward kernel ------------------------
def _forward_kernel(a_ref, x_ref, norm_ref, brow_ref, bcol_ref, dinv_ref,
                    les_ref, w_ref, b_ref, o_ref, *,
                    w_offs, num_gnn, num_graphs, z_dim, gdim,
                    out_dim, view_dim):
    n = x_ref.shape[0]
    g_pad = o_ref.shape[0]

    def load_layer(idx):
        off, fin, fout = w_offs[idx]
        return w_ref[off:off + fin, :fout], b_ref[idx:idx + 1, :fout]

    def dense(v, idx, relu):
        w, b = load_layer(idx)
        y = jnp.dot(v, w, preferred_element_type=jnp.float32) + b
        return jnp.maximum(y, 0.0) if relu else y

    # ---- input normalization: (x - m) / v == x * scale + shift ----
    h = x_ref[...] * norm_ref[0:1, :] + norm_ref[1:2, :]

    # ---- GCN stack: h <- D^-1/2 (A + I) D^-1/2 (h @ W) + b ----
    # Degree normalization is folded onto h (cheap VPU scaling of [N, H]), so
    # the adjacency stays raw bf16 A+I (exact 0/1) for the bf16 MXU path.
    a = a_ref[...]                                  # [N, N] bf16
    dinv = dinv_ref[...]                            # [N, 1] f32
    for i in range(num_gnn):
        w, b = load_layer(i)
        fin, fout = w.shape
        if fin < fout:
            # (A_hat @ h) @ W : cheaper association when fan_in < fan_out.
            p = jnp.dot(a, (h * dinv).astype(jnp.bfloat16),
                        preferred_element_type=jnp.float32) * dinv
            h = jnp.dot(p, w, preferred_element_type=jnp.float32) + b
        else:
            t = jnp.dot(h, w, preferred_element_type=jnp.float32)
            h = jnp.dot(a, (t * dinv).astype(jnp.bfloat16),
                        preferred_element_type=jnp.float32) * dinv + b
        if i < num_gnn - 1:                          # BasicGNN, jk=None
            h = jnp.maximum(h, 0.0)
    hdim = h.shape[1]

    # ---- all_statistics pooling: hstack(mean, min, max, var) per graph ----
    # count / sum / sum-of-squares via MXU with an in-kernel [G, N] mask;
    # min / max stay as masked sublane reductions (cheap at these sizes).
    gid = jax.lax.broadcasted_iota(jnp.int32, (g_pad, n), 0)
    maskf = (gid == brow_ref[...]).astype(jnp.float32)            # [G_pad, N]
    hh = h * h                                                    # hoisted once
    ones_col = jnp.ones((n, 1), jnp.float32)
    cnt = jnp.dot(maskf, ones_col, preferred_element_type=jnp.float32)
    sums = jnp.dot(maskf, h, preferred_element_type=jnp.float32)
    sumsq = jnp.dot(maskf, hh, preferred_element_type=jnp.float32)
    inv_cnt = jnp.where(cnt > 0.0, pl.reciprocal(cnt, approx=True), 0.0)
    mean = sums * inv_cnt
    var = sumsq * inv_cnt - mean * mean    # matches reference E[x^2] - E[x]^2

    big = jnp.float32(1e30)
    batch_col = bcol_ref[...]                                     # [N, 1] int32
    mn_rows, mx_rows = [], []
    for g in range(num_graphs):                                   # static, unrolled
        m = batch_col == g
        mx_rows.append(jnp.max(jnp.where(m, h, -big), axis=0, keepdims=True))
        mn_rows.append(jnp.min(jnp.where(m, h, big), axis=0, keepdims=True))
    if g_pad > num_graphs:
        pad = jnp.zeros((g_pad - num_graphs, hdim), jnp.float32)
        mn_rows.append(pad)
        mx_rows.append(pad)
    mins = jnp.concatenate(mn_rows, axis=0)
    maxs = jnp.concatenate(mx_rows, axis=0)

    # ---- lin1 ----
    # lin1[0] consumes hstack(mean, min, max, var): the weight rows are split
    # into 4 blocks and summed as partial matmuls (no lane concat).
    i0 = num_gnn
    off, _, fout = w_offs[i0]
    b0 = b_ref[i0:i0 + 1, :fout]
    z = (jnp.dot(mean, w_ref[off:off + hdim, :fout],
                 preferred_element_type=jnp.float32)
         + jnp.dot(mins, w_ref[off + hdim:off + 2 * hdim, :fout],
                   preferred_element_type=jnp.float32)
         + jnp.dot(maxs, w_ref[off + 2 * hdim:off + 3 * hdim, :fout],
                   preferred_element_type=jnp.float32)
         + jnp.dot(var, w_ref[off + 3 * hdim:off + 4 * hdim, :fout],
                   preferred_element_type=jnp.float32)
         + b0)
    z = jnp.maximum(z, 0.0)
    z = dense(z, i0 + 1, relu=True)
    z = dense(z, i0 + 2, relu=True)

    # ---- lin2 ----
    # lin2[0] consumes hstack([z, lesion]): weight rows split instead of concat.
    i1 = num_gnn + NUM_LIN1
    off, _, fout = w_offs[i1]
    b1 = b_ref[i1:i1 + 1, :fout]
    out = (jnp.dot(z, w_ref[off:off + z_dim, :fout],
                   preferred_element_type=jnp.float32)
           + jnp.dot(les_ref[...], w_ref[off + z_dim:off + z_dim + gdim, :fout],
                     preferred_element_type=jnp.float32)
           + b1)                                    # == lin2[:2](z)
    v = jnp.maximum(out, 0.0)
    v = dense(v, i1 + 1, relu=True)
    v = dense(v, i1 + 2, relu=True)
    view_pre = dense(v, i1 + 3, relu=False)         # == lin2(z)

    # ---- lane-dense output slab: zero once + two slice stores ----
    o_ref[...] = jnp.zeros_like(o_ref)
    o_ref[:, 0:out_dim] = out
    o_ref[:, out_dim:out_dim + view_dim] = view_pre


# ------------------------- glue: eval-BN weight folding ----------------------
def _fold_bn(layer):
    """Fold eval-mode BatchNorm1d into the preceding Linear: y = x @ W' + b'."""
    if "gamma" not in layer:
        return layer["w"], layer["b"]
    scale = layer["gamma"] * jax.lax.rsqrt(layer["var"] + EPS)   # [1, fout]
    w = layer["w"] * scale
    b = (layer["b"] - layer["mean"]) * scale + layer["beta"]
    return w, b


def _pack_layers(layers):
    """Pack [(w [fin,fout], b [1,fout]), ...] into one weight slab + one bias
    slab (one DMA descriptor each); row offsets 8-aligned for aligned slices."""
    width = _round_up(max(int(w.shape[1]) for w, _ in layers), 128)
    offs, row = [], 0
    for w, _ in layers:
        offs.append((row, int(w.shape[0]), int(w.shape[1])))
        row += _round_up(int(w.shape[0]), 8)
    w_slab = jnp.zeros((_round_up(row, 8), width), jnp.float32)
    b_slab = jnp.zeros((_round_up(len(layers), 8), width), jnp.float32)
    for i, ((off, fin, fout), (w, b)) in enumerate(zip(offs, layers)):
        w_slab = w_slab.at[off:off + fin, :fout].set(w.astype(jnp.float32))
        b_slab = b_slab.at[i, :fout].set(jnp.reshape(b, (fout,)).astype(jnp.float32))
    return w_slab, b_slab, tuple(offs)


def _padded_bytes(shape, dtype):
    shape = (1,) * max(0, 2 - len(shape)) + tuple(int(d) for d in shape)
    lead = 1
    for d in shape[:-2]:
        lead *= d
    return (lead * _round_up(shape[-2], 8) * _round_up(shape[-1], 128)
            * jnp.dtype(dtype).itemsize)


# ------------------------- parameter initialization -------------------------
def _linear_bn(key, fin, fout, with_bn=True):
    ks = jax.random.split(key, 6)
    layer = {
        "w": jax.random.normal(ks[0], (fin, fout), jnp.float32) / jnp.sqrt(float(fin)),
        "b": 0.05 * jax.random.normal(ks[1], (1, fout), jnp.float32),
    }
    if with_bn:
        layer["gamma"] = 1.0 + 0.1 * jax.random.normal(ks[2], (1, fout), jnp.float32)
        layer["beta"] = 0.1 * jax.random.normal(ks[3], (1, fout), jnp.float32)
        layer["mean"] = 0.1 * jax.random.normal(ks[4], (1, fout), jnp.float32)
        layer["var"] = 1.0 + 0.1 * jnp.abs(jax.random.normal(ks[5], (1, fout), jnp.float32))
    return layer


def init_params(key, cfg):
    fin = cfg["gnn_node_features"]
    hid = cfg["gnn_node_emb_dim"]
    nl = cfg["gnn_nb_layers"]
    keys = jax.random.split(key, 16)
    gnn_w, gnn_b = [], []
    d_in = fin
    for i in range(nl):
        kw, kb = jax.random.split(keys[i], 2)
        gnn_w.append(jax.random.normal(kw, (d_in, hid), jnp.float32) / jnp.sqrt(float(d_in)))
        gnn_b.append(0.05 * jax.random.normal(kb, (1, hid), jnp.float32))
        d_in = hid
    pool_mul = 4  # node_pooling == 'all_stats'
    lin1 = [
        _linear_bn(keys[8], hid * pool_mul, 256),
        _linear_bn(keys[9], 256, 128),
        _linear_bn(keys[10], 128, 64),
    ]
    gdim = cfg["lesion_wide_feat_dim"]
    lin2 = [
        _linear_bn(keys[11], 64 + gdim, 32),
        _linear_bn(keys[12], 32, 32),
        _linear_bn(keys[13], 32, 16),
        _linear_bn(keys[14], 16, cfg["nb_classes"], with_bn=False),
    ]
    return {"gnn_w": gnn_w, "gnn_b": gnn_b, "lin1": lin1, "lin2": lin2}


# --------------------------------- forward ----------------------------------
def gnn_classification_forward(params, cfg, x, edge_index, batch, lesion_wide_feat):
    fn = cfg["gnn_node_features"]
    node_x = x[:, :fn].astype(jnp.float32)
    # aux_feats = x[:, fn:] would be the lesion mask; pool_only_lesion_points=False.
    # TODO(synk): pool_only_lesion_points=True needs data-dependent boolean
    # gathering with no static-shape Pallas equivalent; only the False branch here.
    n = node_x.shape[0]

    # (x - m) / v as one [2, F] affine operand (scale row, shift row).
    norm_aff = jnp.concatenate(
        [(1.0 / cfg["v"]).astype(jnp.float32)[None, :],
         (-cfg["m"] / cfg["v"]).astype(jnp.float32)[None, :]], axis=0)

    # Dense A + I in bf16 (exact 0/1); D^-1/2 applied in-kernel so the
    # normalized N x N matrix never round-trips HBM.
    src, dst = edge_index[0], edge_index[1]
    a_pi = jnp.zeros((n, n), jnp.bfloat16).at[dst, src].set(1.0)
    a_pi = a_pi.at[jnp.arange(n), jnp.arange(n)].set(1.0)
    deg = jnp.sum(a_pi.astype(jnp.float32), axis=1)
    dinv_col = jax.lax.rsqrt(deg)[:, None].astype(jnp.float32)

    g = int(cfg["num_graphs"])
    g_pad = _round_up(max(g, 8), 8)      # >= 8 sublane rows for the MLP head
    batch_i32 = batch.astype(jnp.int32)
    batch_row = batch_i32[None, :]
    batch_col = batch_i32[:, None]
    lesion = jnp.zeros((g_pad, cfg["lesion_wide_feat_dim"]), jnp.float32)
    lesion = lesion.at[:g, :].set(lesion_wide_feat.astype(jnp.float32))

    # Fold eval BatchNorm into every Linear, then pack all layers into one
    # weight slab + one bias slab (2 DMA descriptors instead of ~20).
    layers = list(zip(params["gnn_w"], params["gnn_b"]))
    layers += [_fold_bn(l) for l in params["lin1"]]
    layers += [_fold_bn(l) for l in params["lin2"]]
    w_slab, b_slab, w_offs = _pack_layers(layers)

    z_dim = int(params["lin1"][-1]["w"].shape[1])       # 64
    gdim = int(cfg["lesion_wide_feat_dim"])
    out_dim = int(params["lin2"][0]["w"].shape[1])      # 32  (lin2[:2] output)
    view_dim = int(params["lin2"][-1]["w"].shape[1])    # nb_classes
    slab_width = 128                                    # lane-dense output slab

    inputs = [a_pi, node_x, norm_aff, batch_row, batch_col, dinv_col, lesion,
              w_slab, b_slab]
    out_shape = jax.ShapeDtypeStruct((g_pad, slab_width), jnp.float32)

    # Size the VMEM limit from actual (tile-padded) buffer bytes + headroom.
    total = sum(_padded_bytes(t.shape, t.dtype) for t in inputs)
    total += _padded_bytes(out_shape.shape, out_shape.dtype)
    vmem_limit = int(min(96 << 20, _round_up(3 * total + (2 << 20), 1 << 20)))

    kernel = functools.partial(
        _forward_kernel, w_offs=w_offs, num_gnn=len(params["gnn_w"]),
        num_graphs=g, z_dim=z_dim, gdim=gdim, out_dim=out_dim,
        view_dim=view_dim)

    slab = pl.pallas_call(
        kernel,
        out_shape=out_shape,
        in_specs=[_vmem_spec()] * len(inputs),
        out_specs=_vmem_spec(),
        compiler_params=pltpu.CompilerParams(vmem_limit_bytes=vmem_limit),
    )(*inputs)
    # TODO(synk): at large N, tile A+I rows with a "parallel" grid axis sized
    # per generation (64 MiB VMEM on v7x vs 128 MiB on v5e/v6e) to shard across
    # v7x's 2 TensorCores; unnecessary at N=64.

    out = slab[:g, :out_dim]
    view_pre = slab[:g, out_dim:out_dim + view_dim]
    return out, view_pre


if __name__ == "__main__":
    cfg = {
        "gnn_cls_name": "GCN",
        "gnn_node_features": 16,
        "gnn_node_emb_dim": 32,
        "gnn_nb_layers": 3,
        "gnn_dropout": 0.0,            # eval mode -> identity anyway
        "node_pooling": "all_stats",
        "pool_only_lesion_points": False,
        "use_lesion_wide_info": True,
        "lesion_wide_feat_dim": 8,
        "gnn_is_siamese": False,
        "nb_classes": 1,
        "num_graphs": 2,
    }
    key = jax.random.PRNGKey(0)
    kp, kx, km, kv, ke1, ke2, ke3, ke4, kl = jax.random.split(key, 9)
    n_per, g = 32, cfg["num_graphs"]
    n = n_per * g
    aux_dim = 2
    x = jax.random.normal(kx, (n, cfg["gnn_node_features"] + aux_dim), jnp.float32)
    cfg["m"] = 0.1 * jax.random.normal(km, (cfg["gnn_node_features"],), jnp.float32)
    cfg["v"] = 1.0 + jnp.abs(jax.random.normal(kv, (cfg["gnn_node_features"],), jnp.float32))

    e_per = 64
    s0 = jax.random.randint(ke1, (e_per,), 0, n_per)
    d0 = jax.random.randint(ke2, (e_per,), 0, n_per)
    s1 = jax.random.randint(ke3, (e_per,), 0, n_per) + n_per
    d1 = jax.random.randint(ke4, (e_per,), 0, n_per) + n_per
    edge_index = jnp.stack([jnp.concatenate([s0, s1]), jnp.concatenate([d0, d1])])
    batch = jnp.concatenate([jnp.zeros((n_per,), jnp.int32),
                             jnp.ones((n_per,), jnp.int32)])
    lesion_wide = jax.random.normal(kl, (g, cfg["lesion_wide_feat_dim"]), jnp.float32)

    params = init_params(kp, cfg)
    out, view_pre = gnn_classification_forward(params, cfg, x, edge_index,
                                               batch, lesion_wide)
    jax.block_until_ready((out, view_pre))
    assert out.shape == (g, 32) and view_pre.shape == (g, cfg["nb_classes"])
    assert bool(jnp.all(jnp.isfinite(out))) and bool(jnp.all(jnp.isfinite(view_pre)))
    print("KERNEL_OK")
</pallas_src>

<mosaic_0001>
module attributes {stable_mosaic.version = 11 : i64} {
  func.func @_forward_kernel(%arg0: memref<64x64xbf16, #tpu.memory_space<vmem>>, %arg1: memref<64x16xf32, #tpu.memory_space<vmem>>, %arg2: memref<2x16xf32, #tpu.memory_space<vmem>>, %arg3: memref<1x64xi32, #tpu.memory_space<vmem>>, %arg4: memref<64x1xi32, #tpu.memory_space<vmem>>, %arg5: memref<64x1xf32, #tpu.memory_space<vmem>>, %arg6: memref<8x8xf32, #tpu.memory_space<vmem>>, %arg7: memref<744x256xf32, #tpu.memory_space<vmem>>, %arg8: memref<16x256xf32, #tpu.memory_space<vmem>>, %arg9: memref<8x128xf32, #tpu.memory_space<vmem>>) attributes {dimension_semantics = [], scalar_prefetch = 0 : i64, scratch_operands = 0 : i64, tpu.core_type = #tpu.core_type<tc>} {
    %c0 = arith.constant 0 : index
    %c0_0 = arith.constant 0 : index
    %0 = vector.load %arg1[%c0, %c0_0] : memref<64x16xf32, #tpu.memory_space<vmem>>, vector<64x16xf32>
    %c0_1 = arith.constant 0 : index
    %c0_2 = arith.constant 0 : index
    %1 = vector.load %arg2[%c0_1, %c0_2] : memref<2x16xf32, #tpu.memory_space<vmem>>, vector<1x16xf32>
    %2 = vector.broadcast %1 : vector<1x16xf32> to vector<64x16xf32>
    %3 = arith.mulf %0, %2 : vector<64x16xf32>
    %c1 = arith.constant 1 : index
    %c0_3 = arith.constant 0 : index
    %4 = vector.load %arg2[%c1, %c0_3] : memref<2x16xf32, #tpu.memory_space<vmem>>, vector<1x16xf32>
    %5 = vector.broadcast %4 : vector<1x16xf32> to vector<64x16xf32>
    %6 = arith.addf %3, %5 : vector<64x16xf32>
    %c0_4 = arith.constant 0 : index
    %c0_5 = arith.constant 0 : index
    %7 = vector.load %arg0[%c0_4, %c0_5] : memref<64x64xbf16, #tpu.memory_space<vmem>>, vector<64x64xbf16>
    %c0_6 = arith.constant 0 : index
    %c0_7 = arith.constant 0 : index
    %8 = vector.load %arg5[%c0_6, %c0_7] : memref<64x1xf32, #tpu.memory_space<vmem>>, vector<64x1xf32>
    %c0_8 = arith.constant 0 : index
    %c0_9 = arith.constant 0 : index
    %9 = vector.load %arg7[%c0_8, %c0_9] : memref<744x256xf32, #tpu.memory_space<vmem>>, vector<16x32xf32>
    %c0_10 = arith.constant 0 : index
    %c0_11 = arith.constant 0 : index
    %10 = vector.load %arg8[%c0_10, %c0_11] : memref<16x256xf32, #tpu.memory_space<vmem>>, vector<1x32xf32>
    %11 = vector.broadcast %8 : vector<64x1xf32> to vector<64x16xf32>
    %12 = arith.mulf %6, %11 : vector<64x16xf32>
    %13 = arith.truncf %12 : vector<64x16xf32> to vector<64x16xbf16>
    %cst = arith.constant dense<0.000000e+00> : vector<64x16xf32>
    %14 = tpu.matmul %7, %13, %cst {dimension_numbers = #tpu.dot_dimension_numbers<[1], [0], [0], [1], [0, 0, 1, 1], [], []>} : vector<64x64xbf16>, vector<64x16xbf16>, vector<64x16xf32> -> vector<64x16xf32>
    %15 = vector.broadcast %8 : vector<64x1xf32> to vector<64x16xf32>
    %16 = arith.mulf %14, %15 : vector<64x16xf32>
    %cst_12 = arith.constant dense<0.000000e+00> : vector<64x32xf32>
    %17 = tpu.matmul %16, %9, %cst_12 {dimension_numbers = #tpu.dot_dimension_numbers<[1], [0], [0], [1], [0, 0, 1, 1], [], []>} : vector<64x16xf32>, vector<16x32xf32>, vector<64x32xf32> -> vector<64x32xf32>
    %18 = vector.broadcast %10 : vector<1x32xf32> to vector<64x32xf32>
    %19 = arith.addf %17, %18 : vector<64x32xf32>
    %cst_13 = arith.constant 0.000000e+00 : f32
    %20 = vector.broadcast %cst_13 : f32 to vector<64x32xf32>
    %21 = arith.maximumf %19, %20 : vector<64x32xf32>
    %c16 = arith.constant 16 : index
    %c0_14 = arith.constant 0 : index
    %22 = vector.load %arg7[%c16, %c0_14] : memref<744x256xf32, #tpu.memory_space<vmem>>, vector<32x32xf32>
    %c1_15 = arith.constant 1 : index
    %c0_16 = arith.constant 0 : index
    %23 = vector.load %arg8[%c1_15, %c0_16] : memref<16x256xf32, #tpu.memory_space<vmem>>, vector<1x32xf32>
    %cst_17 = arith.constant dense<0.000000e+00> : vector<64x32xf32>
    %24 = tpu.matmul %21, %22, %cst_17 {dimension_numbers = #tpu.dot_dimension_numbers<[1], [0], [0], [1], [0, 0, 1, 1], [], []>} : vector<64x32xf32>, vector<32x32xf32>, vector<64x32xf32> -> vector<64x32xf32>
    %25 = vector.broadcast %8 : vector<64x1xf32> to vector<64x32xf32>
    %26 = arith.mulf %24, %25 : vector<64x32xf32>
    %27 = arith.truncf %26 : vector<64x32xf32> to vector<64x32xbf16>
    %cst_18 = arith.constant dense<0.000000e+00> : vector<64x32xf32>
    %28 = tpu.matmul %7, %27, %cst_18 {dimension_numbers = #tpu.dot_dimension_numbers<[1], [0], [0], [1], [0, 0, 1, 1], [], []>} : vector<64x64xbf16>, vector<64x32xbf16>, vector<64x32xf32> -> vector<64x32xf32>
    %29 = vector.broadcast %8 : vector<64x1xf32> to vector<64x32xf32>
    %30 = arith.mulf %28, %29 : vector<64x32xf32>
    %31 = vector.broadcast %23 : vector<1x32xf32> to vector<64x32xf32>
    %32 = arith.addf %30, %31 : vector<64x32xf32>
    %cst_19 = arith.constant 0.000000e+00 : f32
    %33 = vector.broadcast %cst_19 : f32 to vector<64x32xf32>
    %34 = arith.maximumf %32, %33 : vector<64x32xf32>
    %c48 = arith.constant 48 : index
    %c0_20 = arith.constant 0 : index
    %35 = vector.load %arg7[%c48, %c0_20] : memref<744x256xf32, #tpu.memory_space<vmem>>, vector<32x32xf32>
    %c2 = arith.constant 2 : index
    %c0_21 = arith.constant 0 : index
    %36 = vector.load %arg8[%c2, %c0_21] : memref<16x256xf32, #tpu.memory_space<vmem>>, vector<1x32xf32>
    %cst_22 = arith.constant dense<0.000000e+00> : vector<64x32xf32>
    %37 = tpu.matmul %34, %35, %cst_22 {dimension_numbers = #tpu.dot_dimension_numbers<[1], [0], [0], [1], [0, 0, 1, 1], [], []>} : vector<64x32xf32>, vector<32x32xf32>, vector<64x32xf32> -> vector<64x32xf32>
    %38 = vector.broadcast %8 : vector<64x1xf32> to vector<64x32xf32>
    %39 = arith.mulf %37, %38 : vector<64x32xf32>
    %40 = arith.truncf %39 : vector<64x32xf32> to vector<64x32xbf16>
    %cst_23 = arith.constant dense<0.000000e+00> : vector<64x32xf32>
    %41 = tpu.matmul %7, %40, %cst_23 {dimension_numbers = #tpu.dot_dimension_numbers<[1], [0], [0], [1], [0, 0, 1, 1], [], []>} : vector<64x64xbf16>, vector<64x32xbf16>, vector<64x32xf32> -> vector<64x32xf32>
    %42 = vector.broadcast %8 : vector<64x1xf32> to vector<64x32xf32>
    %43 = arith.mulf %41, %42 : vector<64x32xf32>
    %44 = vector.broadcast %36 : vector<1x32xf32> to vector<64x32xf32>
    %45 = arith.addf %43, %44 : vector<64x32xf32>
    %46 = tpu.iota {dimensions = array<i32: 0>} : vector<8x64xi32>
    %c0_24 = arith.constant 0 : index
    %c0_25 = arith.constant 0 : index
    %47 = vector.load %arg3[%c0_24, %c0_25] : memref<1x64xi32, #tpu.memory_space<vmem>>, vector<1x64xi32>
    %48 = vector.broadcast %47 : vector<1x64xi32> to vector<8x64xi32>
    %49 = arith.cmpi eq, %46, %48 : vector<8x64xi32>
    %50 = arith.extui %49 : vector<8x64xi1> to vector<8x64xi32>
    %51 = arith.sitofp %50 : vector<8x64xi32> to vector<8x64xf32>
    %52 = arith.mulf %45, %45 : vector<64x32xf32>
    %cst_26 = arith.constant 1.000000e+00 : f32
    %53 = vector.broadcast %cst_26 : f32 to vector<64x1xf32>
    %cst_27 = arith.constant dense<0.000000e+00> : vector<8x1xf32>
    %54 = tpu.matmul %51, %53, %cst_27 {dimension_numbers = #tpu.dot_dimension_numbers<[1], [0], [0], [1], [0, 0, 1, 1], [], []>} : vector<8x64xf32>, vector<64x1xf32>, vector<8x1xf32> -> vector<8x1xf32>
    %cst_28 = arith.constant dense<0.000000e+00> : vector<8x32xf32>
    %55 = tpu.matmul %51, %45, %cst_28 {dimension_numbers = #tpu.dot_dimension_numbers<[1], [0], [0], [1], [0, 0, 1, 1], [], []>} : vector<8x64xf32>, vector<64x32xf32>, vector<8x32xf32> -> vector<8x32xf32>
    %cst_29 = arith.constant dense<0.000000e+00> : vector<8x32xf32>
    %56 = tpu.matmul %51, %52, %cst_29 {dimension_numbers = #tpu.dot_dimension_numbers<[1], [0], [0], [1], [0, 0, 1, 1], [], []>} : vector<8x64xf32>, vector<64x32xf32>, vector<8x32xf32> -> vector<8x32xf32>
    %cst_30 = arith.constant 0.000000e+00 : f32
    %57 = vector.broadcast %cst_30 : f32 to vector<8x1xf32>
    %58 = arith.cmpf ogt, %54, %57 : vector<8x1xf32>
    %59 = tpu.reciprocal %54 {approx = true} : vector<8x1xf32> -> vector<8x1xf32>
    %cst_31 = arith.constant 0.000000e+00 : f32
    %60 = vector.broadcast %cst_31 : f32 to vector<8x1xf32>
    %61 = arith.select %58, %59, %60 : vector<8x1xi1>, vector<8x1xf32>
    %62 = vector.broadcast %61 : vector<8x1xf32> to vector<8x32xf32>
    %63 = arith.mulf %55, %62 : vector<8x32xf32>
    %64 = vector.broadcast %61 : vector<8x1xf32> to vector<8x32xf32>
    %65 = arith.mulf %56, %64 : vector<8x32xf32>
    %66 = arith.mulf %63, %63 : vector<8x32xf32>
    %67 = arith.subf %65, %66 : vector<8x32xf32>
    %c0_32 = arith.constant 0 : index
    %c0_33 = arith.constant 0 : index
    %68 = vector.load %arg4[%c0_32, %c0_33] : memref<64x1xi32, #tpu.memory_space<vmem>>, vector<64x1xi32>
    %c0_i32 = arith.constant 0 : i32
    %69 = vector.broadcast %c0_i32 : i32 to vector<64x1xi32>
    %70 = arith.cmpi eq, %68, %69 : vector<64x1xi32>
    %cst_34 = arith.constant 0.000000e+00 : f32
    %cst_35 = arith.constant 1.000000e+30 : f32
    %71 = arith.subf %cst_34, %cst_35 : f32
    %72 = vector.shape_cast %70 : vector<64x1xi1> to vector<64x1xi1>
    %73 = vector.broadcast %72 : vector<64x1xi1> to vector<64x32xi1>
    %74 = vector.broadcast %71 : f32 to vector<64x32xf32>
    %75 = arith.select %73, %45, %74 : vector<64x32xi1>, vector<64x32xf32>
    %cst_36 = arith.constant dense<0xFF800000> : vector<32xf32>
    %76 = vector.multi_reduction <maximumf>, %75, %cst_36 [0] : vector<64x32xf32> to vector<32xf32>
    %77 = vector.shape_cast %76 : vector<32xf32> to vector<1x32xf32>
    %cst_37 = arith.constant 1.000000e+30 : f32
    %78 = vector.shape_cast %70 : vector<64x1xi1> to vector<64x1xi1>
    %79 = vector.broadcast %78 : vector<64x1xi1> to vector<64x32xi1>
    %80 = vector.broadcast %cst_37 : f32 to vector<64x32xf32>
    %81 = arith.select %79, %45, %80 : vector<64x32xi1>, vector<64x32xf32>
    %cst_38 = arith.constant dense<0x7F800000> : vector<32xf32>
    %82 = vector.multi_reduction <minimumf>, %81, %cst_38 [0] : vector<64x32xf32> to vector<32xf32>
    %83 = vector.shape_cast %82 : vector<32xf32> to vector<1x32xf32>
    %c1_i32 = arith.constant 1 : i32
    %84 = vector.broadcast %c1_i32 : i32 to vector<64x1xi32>
    %85 = arith.cmpi eq, %68, %84 : vector<64x1xi32>
    %cst_39 = arith.constant 0.000000e+00 : f32
    %cst_40 = arith.constant 1.000000e+30 : f32
    %86 = arith.subf %cst_39, %cst_40 : f32
    %87 = vector.shape_cast %85 : vector<64x1xi1> to vector<64x1xi1>
    %88 = vector.broadcast %87 : vector<64x1xi1> to vector<64x32xi1>
    %89 = vector.broadcast %86 : f32 to vector<64x32xf32>
    %90 = arith.select %88, %45, %89 : vector<64x32xi1>, vector<64x32xf32>
    %cst_41 = arith.constant dense<0xFF800000> : vector<32xf32>
    %91 = vector.multi_reduction <maximumf>, %90, %cst_41 [0] : vector<64x32xf32> to vector<32xf32>
    %92 = vector.shape_cast %91 : vector<32xf32> to vector<1x32xf32>
    %cst_42 = arith.constant 1.000000e+30 : f32
    %93 = vector.shape_cast %85 : vector<64x1xi1> to vector<64x1xi1>
    %94 = vector.broadcast %93 : vector<64x1xi1> to vector<64x32xi1>
    %95 = vector.broadcast %cst_42 : f32 to vector<64x32xf32>
    %96 = arith.select %94, %45, %95 : vector<64x32xi1>, vector<64x32xf32>
    %cst_43 = arith.constant dense<0x7F800000> : vector<32xf32>
    %97 = vector.multi_reduction <minimumf>, %96, %cst_43 [0] : vector<64x32xf32> to vector<32xf32>
    %98 = vector.shape_cast %97 : vector<32xf32> to vector<1x32xf32>
    %cst_44 = arith.constant 0.000000e+00 : f32
    %99 = vector.broadcast %cst_44 : f32 to vector<6x32xf32>
    %100 = tpu.concatenate %83, %98, %99 in 0 : vector<1x32xf32>, vector<1x32xf32>, vector<6x32xf32> -> vector<8x32xf32>
    %101 = tpu.concatenate %77, %92, %99 in 0 : vector<1x32xf32>, vector<1x32xf32>, vector<6x32xf32> -> vector<8x32xf32>
    %c3 = arith.constant 3 : index
    %c0_45 = arith.constant 0 : index
    %102 = vector.load %arg8[%c3, %c0_45] : memref<16x256xf32, #tpu.memory_space<vmem>>, vector<1x256xf32>
    %c80 = arith.constant 80 : index
    %c0_46 = arith.constant 0 : index
    %103 = vector.load %arg7[%c80, %c0_46] : memref<744x256xf32, #tpu.memory_space<vmem>>, vector<32x256xf32>
    %cst_47 = arith.constant dense<0.000000e+00> : vector<8x256xf32>
    %104 = tpu.matmul %63, %103, %cst_47 {dimension_numbers = #tpu.dot_dimension_numbers<[1], [0], [0], [1], [0, 0, 1, 1], [], []>} : vector<8x32xf32>, vector<32x256xf32>, vector<8x256xf32> -> vector<8x256xf32>
    %c112 = arith.constant 112 : index
    %c0_48 = arith.constant 0 : index
    %105 = vector.load %arg7[%c112, %c0_48] : memref<744x256xf32, #tpu.memory_space<vmem>>, vector<32x256xf32>
    %cst_49 = arith.constant dense<0.000000e+00> : vector<8x256xf32>
    %106 = tpu.matmul %100, %105, %cst_49 {dimension_numbers = #tpu.dot_dimension_numbers<[1], [0], [0], [1], [0, 0, 1, 1], [], []>} : vector<8x32xf32>, vector<32x256xf32>, vector<8x256xf32> -> vector<8x256xf32>
    %107 = arith.addf %104, %106 : vector<8x256xf32>
    %c144 = arith.constant 144 : index
    %c0_50 = arith.constant 0 : index
    %108 = vector.load %arg7[%c144, %c0_50] : memref<744x256xf32, #tpu.memory_space<vmem>>, vector<32x256xf32>
    %cst_51 = arith.constant dense<0.000000e+00> : vector<8x256xf32>
    %109 = tpu.matmul %101, %108, %cst_51 {dimension_numbers = #tpu.dot_dimension_numbers<[1], [0], [0], [1], [0, 0, 1, 1], [], []>} : vector<8x32xf32>, vector<32x256xf32>, vector<8x256xf32> -> vector<8x256xf32>
    %110 = arith.addf %107, %109 : vector<8x256xf32>
    %c176 = arith.constant 176 : index
    %c0_52 = arith.constant 0 : index
    %111 = vector.load %arg7[%c176, %c0_52] : memref<744x256xf32, #tpu.memory_space<vmem>>, vector<32x256xf32>
    %cst_53 = arith.constant dense<0.000000e+00> : vector<8x256xf32>
    %112 = tpu.matmul %67, %111, %cst_53 {dimension_numbers = #tpu.dot_dimension_numbers<[1], [0], [0], [1], [0, 0, 1, 1], [], []>} : vector<8x32xf32>, vector<32x256xf32>, vector<8x256xf32> -> vector<8x256xf32>
    %113 = arith.addf %110, %112 : vector<8x256xf32>
    %114 = vector.broadcast %102 : vector<1x256xf32> to vector<8x256xf32>
    %115 = arith.addf %113, %114 : vector<8x256xf32>
    %cst_54 = arith.constant 0.000000e+00 : f32
    %116 = vector.broadcast %cst_54 : f32 to vector<8x256xf32>
    %117 = arith.maximumf %115, %116 : vector<8x256xf32>
    %c208 = arith.constant 208 : index
    %c0_55 = arith.constant 0 : index
    %118 = vector.load %arg7[%c208, %c0_55] : memref<744x256xf32, #tpu.memory_space<vmem>>, vector<256x128xf32>
    %c4 = arith.constant 4 : index
    %c0_56 = arith.constant 0 : index
    %119 = vector.load %arg8[%c4, %c0_56] : memref<16x256xf32, #tpu.memory_space<vmem>>, vector<1x128xf32>
    %cst_57 = arith.constant dense<0.000000e+00> : vector<8x128xf32>
    %120 = tpu.matmul %117, %118, %cst_57 {dimension_numbers = #tpu.dot_dimension_numbers<[1], [0], [0], [1], [0, 0, 1, 1], [], []>} : vector<8x256xf32>, vector<256x128xf32>, vector<8x128xf32> -> vector<8x128xf32>
    %121 = vector.broadcast %119 : vector<1x128xf32> to vector<8x128xf32>
    %122 = arith.addf %120, %121 : vector<8x128xf32>
    %cst_58 = arith.constant 0.000000e+00 : f32
    %123 = vector.broadcast %cst_58 : f32 to vector<8x128xf32>
    %124 = arith.maximumf %122, %123 : vector<8x128xf32>
    %c464 = arith.constant 464 : index
    %c0_59 = arith.constant 0 : index
    %125 = vector.load %arg7[%c464, %c0_59] : memref<744x256xf32, #tpu.memory_space<vmem>>, vector<128x64xf32>
    %c5 = arith.constant 5 : index
    %c0_60 = arith.constant 0 : index
    %126 = vector.load %arg8[%c5, %c0_60] : memref<16x256xf32, #tpu.memory_space<vmem>>, vector<1x64xf32>
    %cst_61 = arith.constant dense<0.000000e+00> : vector<8x64xf32>
    %127 = tpu.matmul %124, %125, %cst_61 {dimension_numbers = #tpu.dot_dimension_numbers<[1], [0], [0], [1], [0, 0, 1, 1], [], []>} : vector<8x128xf32>, vector<128x64xf32>, vector<8x64xf32> -> vector<8x64xf32>
    %128 = vector.broadcast %126 : vector<1x64xf32> to vector<8x64xf32>
    %129 = arith.addf %127, %128 : vector<8x64xf32>
    %cst_62 = arith.constant 0.000000e+00 : f32
    %130 = vector.broadcast %cst_62 : f32 to vector<8x64xf32>
    %131 = arith.maximumf %129, %130 : vector<8x64xf32>
    %c6 = arith.constant 6 : index
    %c0_63 = arith.constant 0 : index
    %132 = vector.load %arg8[%c6, %c0_63] : memref<16x256xf32, #tpu.memory_space<vmem>>, vector<1x32xf32>
    %c592 = arith.constant 592 : index
    %c0_64 = arith.constant 0 : index
    %133 = vector.load %arg7[%c592, %c0_64] : memref<744x256xf32, #tpu.memory_space<vmem>>, vector<64x32xf32>
    %cst_65 = arith.constant dense<0.000000e+00> : vector<8x32xf32>
    %134 = tpu.matmul %131, %133, %cst_65 {dimension_numbers = #tpu.dot_dimension_numbers<[1], [0], [0], [1], [0, 0, 1, 1], [], []>} : vector<8x64xf32>, vector<64x32xf32>, vector<8x32xf32> -> vector<8x32xf32>
    %c0_66 = arith.constant 0 : index
    %c0_67 = arith.constant 0 : index
    %135 = vector.load %arg6[%c0_66, %c0_67] : memref<8x8xf32, #tpu.memory_space<vmem>>, vector<8x8xf32>
    %c656 = arith.constant 656 : index
    %c0_68 = arith.constant 0 : index
    %136 = vector.load %arg7[%c656, %c0_68] : memref<744x256xf32, #tpu.memory_space<vmem>>, vector<8x32xf32>
    %cst_69 = arith.constant dense<0.000000e+00> : vector<8x32xf32>
    %137 = tpu.matmul %135, %136, %cst_69 {dimension_numbers = #tpu.dot_dimension_numbers<[1], [0], [0], [1], [0, 0, 1, 1], [], []>} : vector<8x8xf32>, vector<8x32xf32>, vector<8x32xf32> -> vector<8x32xf32>
    %138 = arith.addf %134, %137 : vector<8x32xf32>
    %139 = vector.broadcast %132 : vector<1x32xf32> to vector<8x32xf32>
    %140 = arith.addf %138, %139 : vector<8x32xf32>
    %cst_70 = arith.constant 0.000000e+00 : f32
    %141 = vector.broadcast %cst_70 : f32 to vector<8x32xf32>
    %142 = arith.maximumf %140, %141 : vector<8x32xf32>
    %c664 = arith.constant 664 : index
    %c0_71 = arith.constant 0 : index
    %143 = vector.load %arg7[%c664, %c0_71] : memref<744x256xf32, #tpu.memory_space<vmem>>, vector<32x32xf32>
    %c7 = arith.constant 7 : index
    %c0_72 = arith.constant 0 : index
    %144 = vector.load %arg8[%c7, %c0_72] : memref<16x256xf32, #tpu.memory_space<vmem>>, vector<1x32xf32>
    %cst_73 = arith.constant dense<0.000000e+00> : vector<8x32xf32>
    %145 = tpu.matmul %142, %143, %cst_73 {dimension_numbers = #tpu.dot_dimension_numbers<[1], [0], [0], [1], [0, 0, 1, 1], [], []>} : vector<8x32xf32>, vector<32x32xf32>, vector<8x32xf32> -> vector<8x32xf32>
    %146 = vector.broadcast %144 : vector<1x32xf32> to vector<8x32xf32>
    %147 = arith.addf %145, %146 : vector<8x32xf32>
    %cst_74 = arith.constant 0.000000e+00 : f32
    %148 = vector.broadcast %cst_74 : f32 to vector<8x32xf32>
    %149 = arith.maximumf %147, %148 : vector<8x32xf32>
    %c696 = arith.constant 696 : index
    %c0_75 = arith.constant 0 : index
    %150 = vector.load %arg7[%c696, %c0_75] : memref<744x256xf32, #tpu.memory_space<vmem>>, vector<32x16xf32>
    %c8 = arith.constant 8 : index
    %c0_76 = arith.constant 0 : index
    %151 = vector.load %arg8[%c8, %c0_76] : memref<16x256xf32, #tpu.memory_space<vmem>>, vector<1x16xf32>
    %cst_77 = arith.constant dense<0.000000e+00> : vector<8x16xf32>
    %152 = tpu.matmul %149, %150, %cst_77 {dimension_numbers = #tpu.dot_dimension_numbers<[1], [0], [0], [1], [0, 0, 1, 1], [], []>} : vector<8x32xf32>, vector<32x16xf32>, vector<8x16xf32> -> vector<8x16xf32>
    %153 = vector.broadcast %151 : vector<1x16xf32> to vector<8x16xf32>
    %154 = arith.addf %152, %153 : vector<8x16xf32>
    %cst_78 = arith.constant 0.000000e+00 : f32
    %155 = vector.broadcast %cst_78 : f32 to vector<8x16xf32>
    %156 = arith.maximumf %154, %155 : vector<8x16xf32>
    %c728 = arith.constant 728 : index
    %c0_79 = arith.constant 0 : index
    %157 = vector.load %arg7[%c728, %c0_79] : memref<744x256xf32, #tpu.memory_space<vmem>>, vector<16x1xf32>
    %c9 = arith.constant 9 : index
    %c0_80 = arith.constant 0 : index
    %158 = vector.load %arg8[%c9, %c0_80] : memref<16x256xf32, #tpu.memory_space<vmem>>, vector<1x1xf32>
    %cst_81 = arith.constant dense<0.000000e+00> : vector<8x1xf32>
    %159 = tpu.matmul %156, %157, %cst_81 {dimension_numbers = #tpu.dot_dimension_numbers<[1], [0], [0], [1], [0, 0, 1, 1], [], []>} : vector<8x16xf32>, vector<16x1xf32>, vector<8x1xf32> -> vector<8x1xf32>
    %160 = vector.broadcast %158 : vector<1x1xf32> to vector<8x1xf32>
    %161 = arith.addf %159, %160 : vector<8x1xf32>
    %cst_82 = arith.constant 0.000000e+00 : f32
    %162 = vector.broadcast %cst_82 : f32 to vector<8x128xf32>
    %c0_83 = arith.constant 0 : index
    %c0_84 = arith.constant 0 : index
    %163 = vector.load %arg9[%c0_83, %c0_84] : memref<8x128xf32, #tpu.memory_space<vmem>>, vector<8x128xf32>
    tpu.vector_store %arg9[%c0_83, %c0_84], %162 {strides = array<i32>} : memref<8x128xf32, #tpu.memory_space<vmem>>, vector<8x128xf32>,
    %c0_85 = arith.constant 0 : index
    %c0_86 = arith.constant 0 : index
    %164 = vector.load %arg9[%c0_85, %c0_86] : memref<8x128xf32, #tpu.memory_space<vmem>>, vector<8x32xf32>
    tpu.vector_store %arg9[%c0_85, %c0_86], %140 {strides = array<i32>} : memref<8x128xf32, #tpu.memory_space<vmem>>, vector<8x32xf32>,
    %c0_87 = arith.constant 0 : index
    %c32 = arith.constant 32 : index
    %165 = vector.load %arg9[%c0_87, %c32] : memref<8x128xf32, #tpu.memory_space<vmem>>, vector<8x1xf32>
    tpu.vector_store %arg9[%c0_87, %c32], %161 {strides = array<i32>} : memref<8x128xf32, #tpu.memory_space<vmem>>, vector<8x1xf32>,
    return
  }
}

</mosaic_0001>

<bundles_post_ra>
// kernel: tpu_custom_call.1
= control target key start
LH: loop header
LB: loop body
LE: loop exit
PB: predicated region body
PF: predicated region fallthrough
CT: control target
= control target key end

     0   :  { %14 = vsyncpa [#allocation3], 0  ;;  %s3664_s0 = inlined_call_operand.vmem [shape: bf16[64,64], index: 0, kind: input, shape index: {}]   ;;  %s3665_s1 = inlined_call_operand.vmem [shape: f32[64,16], index: 1, kind: input, shape index: {}]   ;;  %s3666_s2 = inlined_call_operand.vmem [shape: f32[2,16], index: 2, kind: input, shape index: {}]   ;;  %s3667_s3 = inlined_call_operand.vmem [shape: s32[1,64], index: 3, kind: input, shape index: {}]   ;;  %s3668_s4 = inlined_call_operand.vmem [shape: s32[64,1], index: 4, kind: input, shape index: {}]   ;;  %s3669_s5 = inlined_call_operand.vmem [shape: f32[64,1], index: 5, kind: input, shape index: {}]   ;;  %s3670_s6 = inlined_call_operand.vmem [shape: f32[8,8], index: 6, kind: input, shape index: {}]   ;;  %s3671_s7 = inlined_call_operand.hbm [shape: f32[744,256], index: 7, kind: input, shape index: {}]   ;;  %s3672_s8 = inlined_call_operand.vmem [shape: f32[16,256], index: 8, kind: input, shape index: {}]   ;;  %s3673_s9 = inlined_call_operand.hbm [shape: f32[8,128], index: 9, kind: output, shape index: {}]  }
   0x1   :  { %15 = vsyncpa [#allocation4], 0  ;;  %s2994_s30 = smov [#allocation2]   ;;  %s2946_s13 = scalar_lea.hbm %s3671_s7, 23808 }
   0x2   :  { %s35_s10 = sshll.u32 %s2994_s30, 4  ;;  %p2947_p0 = scmp.ne.s32.totalorder %s3671_s7, %s2946_s13  ;;  %s36_s10 = int_to_ptr.vmem [resolvable:$true] %s35_s10 }
   0x3   :  { %p2950_p1 = scmp.lt.u32.totalorder %s2946_s13, %s3671_s7 }
   0x5   :  { %p2952_p2 = pnand %p2950_p1, %p2947_p0 }
   0x7   :  { %2955 = shalt.err (!%p2952_p2)
}
   0x8   :  { %s2956_s18 = scalar_lea.vmem %s36_s10, 23808  ;;  %p2961_p4 = scmp.lt.s32.totalorder %s36_s10, %s36_s10 }
   0x9   :  { %p2957_p3 = scmp.ne.s32.totalorder %s36_s10, %s2956_s18  ;;  %p2962_p5 = scmp.lt.s32.totalorder %s2956_s18, %s2956_s18 }
   0xb   :  { %p2963_p6 = por %p2962_p5, %p2961_p4 }
   0xd   :  { %p2964_p7 = pnand %p2963_p6, %p2957_p3 }
   0xf   :  { %2967 = shalt.err (!%p2964_p7)
}
  0x10   :  { %s2995_s19 = smov 256   ;;  %s2996_s20 = smov 16  }
  0x11   :  { %41 = dma.hbm_to_vmem [thread:$0]  %s3671_s7, 23808, %s36_s10, [#allocation3], %s2995_s19, %s2995_s19, %s2996_s20  }
  0x12   :  { %2990 = dma.done.wait [#allocation3], 23808  }
  0x13   :  { %2991 = vsyncadd [#allocation3], 4294943488  ;;  %v2997_v0 = vmov 0   ;;  %v92_v1 = vld [vmem:[%s3669_s5 + $0x10] sm:$0xff]  ;;  %v90_v2 = vld [vmem:[%s3669_s5] sm:$0xff]  ;;  %vm173_vm8 = vcmask 523264  }
  0x14   :  { %2938 = vset.pattern.permute.xlu1 %v2997_v0  ;;  %2937 = vset.pattern.permute.xlu0 %v2997_v0  ;;  %v93_v3 = vld [vmem:[%s3669_s5 + $0x18] sm:$0xff]  ;;  %v91_v4 = vld [vmem:[%s3669_s5 + $0x8] sm:$0xff]  ;;  %v94_v6 = vld [vmem:[%s3669_s5 + $0x20] sm:$0xff]  ;;  %s3003_s29 = smov [#allocation5]  }
  0x15   :  { %113 = vperm.xlu1 %2938, %v92_v1   ;;  %103 = vperm.xlu0 %2937, %v90_v2   ;;  %v95_v5 = vld [vmem:[%s3669_s5 + $0x28] sm:$0xff]  ;;  %v1103_v8 = vld [vmem:[%s3668_s4] sm:$0xff]  ;;  %v97_v9 = vld [vmem:[%s3669_s5 + $0x38] sm:$0xff]  ;;  %s2278_s30 = sshll.u32 %s3003_s29, 4  ;;  %s2279_s30 = int_to_ptr.vmem [resolvable:$true] %s2278_s30 }
  0x16   :  { %v1104_v7 = vld [vmem:[%s3668_s4 + $0x8] sm:$0xff]  ;;  %v96_v10 = vld [vmem:[%s3669_s5 + $0x30] sm:$0xff]  ;;  %vm1111_vm1 = vcmp.eq.s32.totalorder %v1103_v8, 0  ;;  %v1106_v11 = vld [vmem:[%s3668_s4 + $0x18] sm:$0xff]  ;;  %vm1217_vm10 = vcmp.eq.s32.totalorder %v1103_v8, 1  ;;  %s2968_s10 = scalar_lea.vmem %s2279_s30, 128  ;;  %p2973_p9 = scmp.lt.s32.totalorder %s2279_s30, %s2279_s30 }
  0x17   :  { %vm1112_vm0 = vcmp.eq.s32.totalorder %v1104_v7, 0  ;;  %v1105_v12 = vld [vmem:[%s3668_s4 + $0x10] sm:$0xff]  ;;  %v1119_v14 = vsel %vm1111_vm1, 1, %v2997_v0  ;;  %vm1114_vm2 = vcmp.eq.s32.totalorder %v1106_v11, 0  ;;  %v1108_v15 = vld [vmem:[%s3668_s4 + $0x28] sm:$0xff]  ;;  %v1107_v16 = vld [vmem:[%s3668_s4 + $0x20] sm:$0xff]  ;;  %p2969_p8 = scmp.ne.s32.totalorder %s2279_s30, %s2968_s10  ;;  %p2974_p10 = scmp.lt.s32.totalorder %s2968_s10, %s2968_s10 }
  0x18   :  { %v1120_v13 = vsel %vm1112_vm0, 1, %v2997_v0  ;;  %vm1113_vm3 = vcmp.eq.s32.totalorder %v1105_v12, 0  ;;  %v1122_v17 = vsel %vm1114_vm2, 1, %v2997_v0  ;;  %vm1116_vm4 = vcmp.eq.s32.totalorder %v1108_v15, 0  ;;  %v1110_v19 = vld [vmem:[%s3668_s4 + $0x38] sm:$0xff]  ;;  %v1109_v20 = vld [vmem:[%s3668_s4 + $0x30] sm:$0xff] }
  0x19   :  { %118 = vperm.xlu1 %2938, %v93_v3   ;;  %108 = vperm.xlu0 %2937, %v91_v4   ;;  %v1121_v18 = vsel %vm1113_vm3, 1, %v2997_v0  ;;  %vm1115_vm5 = vcmp.eq.s32.totalorder %v1107_v16, 0  ;;  %v1124_v21 = vsel %vm1116_vm4, 1, %v2997_v0  ;;  %v3125_v23 = vld [vmem:[%s3664_s0] sm:$0xff]   ;;  %vm1118_vm6 = vcmp.eq.s32.totalorder %v1110_v19, 0  ;;  %v49_v35 = vld [vmem:[%s3665_s1 + $0x8] sm:$0xff]  ;;  %p2975_p11 = por %p2974_p10, %p2973_p9 }
  0x1a   :  { %v1123_v22 = vsel %vm1115_vm5, 1, %v2997_v0  ;;  %vm1117_vm7 = vcmp.eq.s32.totalorder %v1109_v20, 0  ;;  %2513 = vmatprep.mubr.msk.bf16.mxu0 %vm173_vm8, %v3125_v23  ;;  %v1126_v24 = vsel %vm1118_vm6, 1, %v2997_v0  ;;  %vm1218_vm9 = vcmp.eq.s32.totalorder %v1104_v7, 1  ;;  %v48_v34 = vld [vmem:[%s3665_s1] sm:$0xff]  ;;  %v50_v37 = vld [vmem:[%s3665_s1 + $0x10] sm:$0xff] }
  0x1b   :  { %v1125_v25 = vsel %vm1117_vm7, 1, %v2997_v0  ;;  %v1226_v26 = vsel %vm1218_vm9, 1, %v2997_v0  ;;  %v1225_v27 = vsel %vm1217_vm10, 1, %v2997_v0  ;;  %vm1220_vm11 = vcmp.eq.s32.totalorder %v1106_v11, 1  ;;  %v2287_v36 = vld [vmem:[%s3666_s2] ss:$0 sm:$0xff]  ;;  %p2976_p12 = pnand %p2975_p11, %p2969_p8 }
  0x1c   :  { %vm1219_vm12 = vcmp.eq.s32.totalorder %v1105_v12, 1  ;;  %v1228_v28 = vsel %vm1220_vm11, 1, %v2997_v0  ;;  %vm1222_vm13 = vcmp.eq.s32.totalorder %v1108_v15, 1  ;;  %vm1221_vm14 = vcmp.eq.s32.totalorder %v1107_v16, 1  ;;  %v51_v38 = vld [vmem:[%s3665_s1 + $0x18] sm:$0xff]  ;;  %v52_v43 = vld [vmem:[%s3665_s1 + $0x20] sm:$0xff] }
  0x1d   :  { %128 = vperm.xlu1 %2938, %v95_v5   ;;  %123 = vperm.xlu0 %2937, %v94_v6   ;;  %v1227_v29 = vsel %vm1219_vm12, 1, %v2997_v0  ;;  %v1230_v30 = vsel %vm1222_vm13, 1, %v2997_v0  ;;  %v1229_v31 = vsel %vm1221_vm14, 1, %v2997_v0  ;;  %vm1224_vm15 = vcmp.eq.s32.totalorder %v1110_v19, 1  ;;  %v53_v44 = vld [vmem:[%s3665_s1 + $0x28] sm:$0xff]  ;;  %v54_v54 = vld [vmem:[%s3665_s1 + $0x30] sm:$0xff] }
  0x1e   :  { %vm1223_vm0 = vcmp.eq.s32.totalorder %v1109_v20, 1  ;;  %v1232_v32 = vsel %vm1224_vm15, 1, %v2997_v0  ;;  %v61_v39 = vmul.f32 %v2287_v36, %v48_v34  ;;  %v62_v40 = vmul.f32 %v2287_v36, %v49_v35  ;;  %v2288_v45 = vld [vmem:[%s3666_s2 + $0x1] ss:$0 sm:$0xff]  ;;  %v55_v55 = vld [vmem:[%s3665_s1 + $0x38] sm:$0xff]  ;;  %v3196_v16 = vld [vmem:[%s3664_s0 + $0x8] sm:$0xff]  }
  0x1f   :  { %v1231_v33 = vsel %vm1223_vm0, 1, %v2997_v0  ;;  %v63_v41 = vmul.f32 %v2287_v36, %v50_v37  ;;  %v64_v42 = vmul.f32 %v2287_v36, %v51_v38  ;;  %v65_v48 = vmul.f32 %v2287_v36, %v52_v43  ;;  %v98_v19 = vld [vmem:[#allocation2] sm:$0xff]  ;;  %v99_v20 = vld [vmem:[#allocation2 + $0x10] sm:$0xff]  ;;  %s3002_s2 = smov 32  }
  0x20   :  { %v66_v49 = vmul.f32 %v2287_v36, %v53_v44  ;;  %v74_v50 = vadd.f32 %v2288_v45, %v61_v39  ;;  %v75_v51 = vadd.f32 %v2288_v45, %v62_v40  ;;  %v67_v60 = vmul.f32 %v2287_v36, %v54_v54 }
  0x21   :  { %138 = vperm.xlu1 %2938, %v97_v9   ;;  %133 = vperm.xlu0 %2937, %v96_v10   ;;  %v76_v52 = vadd.f32 %v2288_v45, %v63_v41  ;;  %v77_v53 = vadd.f32 %v2288_v45, %v64_v42  ;;  %v78_v58 = vadd.f32 %v2288_v45, %v65_v48  ;;  %vm259_vm1 = vcmask 130048  }
  0x22   :  { %v79_v59 = vadd.f32 %v2288_v45, %v66_v49  ;;  %v68_v61 = vmul.f32 %v2287_v36, %v55_v55  ;;  %v80_v5 = vadd.f32 %v2288_v45, %v67_v60  ;;  %vm402_vm2 = vcmask 261120  }
  0x23   :  { %vm3001_vm4 = vmmov 0  }
  0x24   :  { %v81_v9 = vadd.f32 %v2288_v45, %v68_v61  ;;  %v100_v45 = vld [vmem:[%s3672_s8] ss:$0 sm:$0xff] }
  0x25   :  { %1131 = vperm.xlu1 %2938, %v1120_v13   ;;  %1128 = vperm.xlu0 %2937, %v1119_v14  }
  0x29   :  { %1137 = vperm.xlu1 %2938, %v1122_v17   ;;  %1134 = vperm.xlu0 %2937, %v1121_v18   ;;  %v3201_v17 = vld [vmem:[%s3664_s0 + $0x10] sm:$0xff]   ;;  %v3210_v18 = vld [vmem:[%s3664_s0 + $0x18] sm:$0xff]  }
  0x2d   :  { %1143 = vperm.xlu1 %2938, %v1124_v21   ;;  %1140 = vperm.xlu0 %2937, %v1123_v22   ;;  %v2754_v21 = vpack.c.bf16 %v99_v20, %v98_v19  ;;  %v397_v22 = vld [vmem:[#allocation2 + $0x20] sm:$0xff] }
  0x2f   :  { %2755 = vmatprep.subr.bf16.mxu1 %v2754_v21 }
  0x30   :  { %2757 = vmatpush3.bf16.msra.mxu1 %v2754_v21 }
  0x31   :  { %1149 = vperm.xlu1 %2938, %v1126_v24   ;;  %1146 = vperm.xlu0 %2937, %v1125_v25   ;;  %v398_v24 = vld [vmem:[#allocation2 + $0x30] sm:$0xff] }
  0x32   :  { %v2758_v25 = vpack.c.bf16 %v398_v24, %v397_v22 }
  0x34   :  { %2759 = vmatprep.subr.bf16.mxu1 %v2758_v25 }
  0x35   :  { %1237 = vperm.xlu1 %2938, %v1226_v26   ;;  %1234 = vperm.xlu0 %2937, %v1225_v27  }
  0x39   :  { %1243 = vperm.xlu1 %2938, %v1228_v28   ;;  %1240 = vperm.xlu0 %2937, %v1227_v29   ;;  %v399_v28 = vld [vmem:[#allocation2 + $0x40] sm:$0xff]  ;;  %v400_v29 = vld [vmem:[#allocation2 + $0x50] sm:$0xff] }
  0x3a   :  { %v2762_v34 = vpack.c.bf16 %v400_v29, %v399_v28 }
  0x3d   :  { %1249 = vperm.xlu1 %2938, %v1230_v30   ;;  %1246 = vperm.xlu0 %2937, %v1229_v31  }
  0x41   :  { %1255 = vperm.xlu1 %2938, %v1232_v32   ;;  %1252 = vperm.xlu0 %2937, %v1231_v33  }
  0x94   :  { %v3163_v46 = vpop.permute.xlu1 %113  ;;  %v3165_v47 = vpop.permute.xlu0 %103 }
  0x95   :  { %v141_v62 = vmul.f32 %v3165_v47, %v74_v50  ;;  %v143_v0 = vmul.f32 %v3163_v46, %v76_v52 }
  0x98   :  { %v3173_v56 = vpop.permute.xlu1 %118  ;;  %v3175_v57 = vpop.permute.xlu0 %108 }
  0x99   :  { %v142_v63 = vmul.f32 %v3175_v57, %v75_v51  ;;  %v144_v1 = vmul.f32 %v3173_v56, %v77_v53 }
  0x9b   :  { %v149_v2 = vpack.c.bf16 %v142_v63, %v141_v62  ;;  %v150_v6 = vpack.c.bf16 %v144_v1, %v143_v0 }
  0x9c   :  { %v3181_v3 = vpop.permute.xlu1 %128  ;;  %v3183_v4 = vpop.permute.xlu0 %123 }
  0x9d   :  { %2505 = vmatprep.subr.bf16.mxu0 %v149_v2  ;;  %v145_v7 = vmul.f32 %v3183_v4, %v78_v58  ;;  %v146_v8 = vmul.f32 %v3181_v3, %v79_v59 }
  0x9e   :  { %2506 = vmatpush3.bf16.msra.mxu0 %v149_v2 }
  0x9f   :  { %2507 = vmatprep.subr.bf16.mxu0 %v150_v6  ;;  %v151_v12 = vpack.c.bf16 %v146_v8, %v145_v7 }
  0xa0   :  { %v3187_v10 = vpop.permute.xlu1 %138  ;;  %v3189_v11 = vpop.permute.xlu0 %133 }
  0xa1   :  { %v147_v13 = vmul.f32 %v3189_v11, %v80_v5  ;;  %v148_v14 = vmul.f32 %v3187_v10, %v81_v9 }
  0xa2   :  { %2508 = vmatpush3.bf16.msra.mxu0 %v150_v6 }
  0xa3   :  { %2509 = vmatprep.subr.bf16.mxu0 %v151_v12  ;;  %v152_v15 = vpack.c.bf16 %v148_v14, %v147_v13  ;;  %v633_v14 = vld [vmem:[#allocation2 + $0x60] sm:$0xff] }
  0xa6   :  { %2510 = vmatpush3.bf16.msra.mxu0 %v151_v12 }
  0xa7   :  { %2511 = vmatprep.subr.bf16.mxu0 %v152_v15 }
  0xaa   :  { %2512 = vmatpush3.bf16.msra.mxu0 %v152_v15  ;;  %v634_v15 = vld [vmem:[#allocation2 + $0x70] sm:$0xff] }
  0xab   :  { %v2766_v19 = vpack.c.bf16 %v634_v15, %v633_v14 }
  0xad   :  { %2514 = vmatmul.mubr.msk.bf16.vlgmr.msra.gmra.mrb[0].mxu0 %vm173_vm8, %v3196_v16 }
  0xae   :  { %2517 = vmatprep.mubr.msk.bf16.mxu0 %vm173_vm8, %v3201_v17 }
  0xb5   :  { %2518 = vmatmul.mubr.msk.bf16.gmra.mrb[4].mxu0 %vm173_vm8, %v3210_v18 }
  0xb6   :  { %2565 = vmatprep.mubr.msk.bf16.mxu0 %vm173_vm8, %v3125_v23 }
 0x180   :  { %v2515_v26 = vpop.f32.mrb[0].mxu0 }
 0x181   :  { %v220_v27 = vpop.f32.mrb[1].mxu0  ;;  %v253_v35 = vmul.f32 %v2515_v26, %v3163_v46 }
 0x182   :  { %v251_v30 = vmul.f32 %v220_v27, %v3165_v47  ;;  %v2516_v31 = vpop.f32.mrb[2].mxu0 }
 0x183   :  { %v223_v32 = vpop.f32.mrb[3].mxu0  ;;  %v254_v36 = vmul.f32 %v2516_v31, %v3173_v56 }
 0x184   :  { %v252_v33 = vmul.f32 %v223_v32, %v3175_v57  ;;  %2525 = vmatprep.mubr.msk.f32.mxu1 %vm259_vm1, %v251_v30 }
 0x186   :  { %2526 = vmatmul.mubr.msk.f32.vlgmr.msra.gmra.mrb[0].mxu1 %vm259_vm1, %v252_v33 }
 0x187   :  { %2528 = vmatprep.mubr.msk.f32.mxu1 %vm259_vm1, %v253_v35  ;;  %2761 = vmatpush3.bf16.msra.mxu1 %v2758_v25 }
 0x188   :  { %v2519_v37 = vpop.f32.mrb[4].mxu0  ;;  %2763 = vmatprep.subr.bf16.mxu1 %v2762_v34 }
 0x189   :  { %v236_v38 = vpop.f32.mrb[5].mxu0  ;;  %v257_v43 = vmul.f32 %v2519_v37, %v3189_v11 }
 0x18a   :  { %v255_v39 = vmul.f32 %v236_v38, %v3183_v4  ;;  %v2520_v40 = vpop.f32.mrb[6].mxu0  ;;  %2529 = vmatmul.mubr.msk.f32.gmra.mrb[2].mxu1 %vm259_vm1, %v254_v36 }
 0x18b   :  { %v239_v41 = vpop.f32.mrb[7].mxu0  ;;  %2765 = vmatpush3.bf16.msra.mxu1 %v2762_v34  ;;  %v258_v44 = vmul.f32 %v2520_v40, %v3187_v10 }
 0x18c   :  { %v256_v42 = vmul.f32 %v239_v41, %v3181_v3  ;;  %2531 = vmatprep.mubr.msk.f32.mxu1 %vm259_vm1, %v255_v39  ;;  %2767 = vmatprep.subr.bf16.mxu1 %v2766_v19  ;;  %v635_v41 = vld [vmem:[#allocation2 + $0x80] sm:$0xff] }
 0x18e   :  { %2532 = vmatmul.mubr.msk.f32.gmra.mrb[4].mxu1 %vm259_vm1, %v256_v42  ;;  %v636_v42 = vld [vmem:[#allocation2 + $0x90] sm:$0xff] }
 0x18f   :  { %2534 = vmatprep.mubr.msk.f32.mxu1 %vm259_vm1, %v257_v43  ;;  %v2770_v43 = vpack.c.bf16 %v636_v42, %v635_v41 }
 0x192   :  { %2535 = vmatmul.mubr.msk.f32.gmra.mrb[6].mxu1 %vm259_vm1, %v258_v44  ;;  %v2998_v44 = vmov 0.0|0.0  }
 0x259   :  { %v2527_v48 = vpop.f32.mrb[0].mxu1 }
 0x25a   :  { %v356_v49 = vadd.f32 %v2527_v48, %v100_v45  ;;  %v350_v50 = vpop.f32.mrb[1].mxu1 }
 0x25b   :  { %v351_v51 = vadd.f32 %v350_v50, %v100_v45 }
 0x25c   :  { %v390_v54 = vmax.f32 %v356_v49, 0.0  ;;  %v401_v49 = vld [vmem:[%s3672_s8 + $0x1] ss:$0 sm:$0xff] }
 0x25d   :  { %v389_v52 = vmax.f32 %v351_v51, 0.0  ;;  %v2530_v53 = vpop.f32.mrb[2].mxu1 }
 0x25e   :  { %v366_v55 = vadd.f32 %v2530_v53, %v100_v45  ;;  %v360_v58 = vpop.f32.mrb[3].mxu1 }
 0x25f   :  { %v361_v59 = vadd.f32 %v360_v58, %v100_v45  ;;  %2545 = vmatprep.mubr.msk.f32.mxu1 %vm402_vm2, %v389_v52 }
 0x260   :  { %2546 = vmatmul.mubr.msk.f32.vlgmr.msra.gmra.mrb[8].mxu1 %vm402_vm2, %v390_v54  ;;  %v392_v62 = vmax.f32 %v366_v55, 0.0 }
 0x261   :  { %v391_v60 = vmax.f32 %v361_v59, 0.0  ;;  %v2533_v61 = vpop.f32.mrb[4].mxu1  ;;  %2769 = vmatpush3.bf16.msra.mxu1 %v2766_v19 }
 0x262   :  { %v376_v63 = vadd.f32 %v2533_v61, %v100_v45  ;;  %v370_v0 = vpop.f32.mrb[5].mxu1  ;;  %2771 = vmatprep.subr.bf16.mxu1 %v2770_v43 }
 0x263   :  { %v371_v1 = vadd.f32 %v370_v0, %v100_v45  ;;  %2548 = vmatprep.mubr.msk.f32.mxu1 %vm402_vm2, %v391_v60 }
 0x264   :  { %2549 = vmatmul.mubr.msk.f32.gmra.mrb[10].mxu1 %vm402_vm2, %v392_v62  ;;  %v394_v6 = vmax.f32 %v376_v63, 0.0 }
 0x265   :  { %v393_v2 = vmax.f32 %v371_v1, 0.0  ;;  %v2536_v5 = vpop.f32.mrb[6].mxu1  ;;  %2773 = vmatpush3.bf16.msra.mxu1 %v2770_v43 }
 0x266   :  { %v386_v7 = vadd.f32 %v2536_v5, %v100_v45  ;;  %v380_v8 = vpop.f32.mrb[7].mxu1  ;;  %2774 = vmatprep.subr.bf16.mxu1 %v2998_v44 }
 0x267   :  { %v381_v9 = vadd.f32 %v380_v8, %v100_v45  ;;  %2551 = vmatprep.mubr.msk.f32.mxu1 %vm402_vm2, %v393_v2  ;;  %v2999_v45 = vmov 0.0  }
 0x268   :  { %2552 = vmatmul.mubr.msk.f32.gmra.mrb[12].mxu1 %vm402_vm2, %v394_v6  ;;  %v396_v13 = vmax.f32 %v386_v7, 0.0  ;;  %2264 = vst [vmem:[#allocation5] sm:$0xff] %v2999_v45 }
 0x269   :  { %v395_v12 = vmax.f32 %v381_v9, 0.0  ;;  %v3000_v9 = vmov 1.0|1.0  }
 0x26b   :  { %2554 = vmatprep.mubr.msk.f32.mxu1 %vm402_vm2, %v395_v12  ;;  %v860_v12 = vlaneseq }
 0x26c   :  { %2555 = vmatmul.mubr.msk.f32.gmra.mrb[14].mxu1 %vm402_vm2, %v396_v13 }
 0x333   :  { %v2547_v20 = vpop.f32.mrb[8].mxu1 }
 0x334   :  { %v533_v21 = vmul.f32 %v2547_v20, %v3175_v57  ;;  %v493_v22 = vpop.f32.mrb[9].mxu1 }
 0x335   :  { %v532_v24 = vmul.f32 %v493_v22, %v3165_v47 }
 0x337   :  { %v540_v25 = vpack.c.bf16 %v533_v21, %v532_v24  ;;  %v2550_v26 = vpop.f32.mrb[10].mxu1 }
 0x338   :  { %v535_v27 = vmul.f32 %v2550_v26, %v3173_v56  ;;  %v503_v28 = vpop.f32.mrb[11].mxu1  ;;  %v3279_v26 = vshrl.u32 %v860_v12, 7 }
 0x339   :  { %v534_v29 = vmul.f32 %v503_v28, %v3163_v46  ;;  %2557 = vmatprep.subr.bf16.mxu0 %v540_v25  ;;  %v2329_v28 = vld [vmem:[%s3667_s3] ss:$0 sm:$0xff] }
 0x33a   :  { %2558 = vmatpush3.bf16.msra.mxu0 %v540_v25  ;;  %vm867_vm3 = vcmp.eq.s32.totalorder %v3279_v26, %v2329_v28 }
 0x33b   :  { %v541_v30 = vpack.c.bf16 %v535_v27, %v534_v29  ;;  %v2553_v31 = vpop.f32.mrb[12].mxu1 }
 0x33c   :  { %v537_v32 = vmul.f32 %v2553_v31, %v3181_v3  ;;  %v513_v33 = vpop.f32.mrb[13].mxu1 }
 0x33d   :  { %v536_v34 = vmul.f32 %v513_v33, %v3183_v4  ;;  %2559 = vmatprep.subr.bf16.mxu0 %v541_v30 }
 0x33e   :  { %2560 = vmatpush3.bf16.msra.mxu0 %v541_v30  ;;  %v3292_v30 = vsel %vm867_vm3, 1.0, %v2999_v45 }
 0x33f   :  { %v542_v35 = vpack.c.bf16 %v537_v32, %v536_v34  ;;  %v2556_v36 = vpop.f32.mrb[14].mxu1 }
 0x340   :  { %v539_v37 = vmul.f32 %v2556_v36, %v3187_v10  ;;  %v523_v38 = vpop.f32.mrb[15].mxu1 }
 0x341   :  { %v538_v39 = vmul.f32 %v523_v38, %v3189_v11  ;;  %2561 = vmatprep.subr.bf16.mxu0 %v542_v35 }
 0x342   :  { %2562 = vmatpush3.bf16.msra.mxu0 %v542_v35 }
 0x343   :  { %v543_v40 = vpack.c.bf16 %v539_v37, %v538_v39 }
 0x345   :  { %2563 = vmatprep.subr.bf16.mxu0 %v543_v40 }
 0x346   :  { %2564 = vmatpush3.bf16.msra.mxu0 %v543_v40 }
 0x349   :  { %2566 = vmatmul.mubr.msk.bf16.vlgmr.msra.gmra.mrb[8].mxu0 %vm173_vm8, %v3196_v16 }
 0x34a   :  { %2569 = vmatprep.mubr.msk.bf16.mxu0 %vm173_vm8, %v3201_v17 }
 0x351   :  { %2570 = vmatmul.mubr.msk.bf16.gmra.mrb[12].mxu0 %vm173_vm8, %v3210_v18 }
 0x352   :  { %2601 = vmatprep.mubr.msk.bf16.mxu0 %vm173_vm8, %v3125_v23 }
 0x41c   :  { %v2567_v48 = vpop.f32.mrb[8].mxu0 }
 0x41d   :  { %v611_v50 = vmul.f32 %v2567_v48, %v3163_v46  ;;  %v578_v51 = vpop.f32.mrb[9].mxu0 }
 0x41e   :  { %v609_v23 = vmul.f32 %v578_v51, %v3165_v47  ;;  %v2568_v52 = vpop.f32.mrb[10].mxu0 }
 0x41f   :  { %v581_v53 = vpop.f32.mrb[11].mxu0  ;;  %v612_v55 = vmul.f32 %v2568_v52, %v3173_v56  ;;  %v619_v59 = vadd.f32 %v611_v50, %v401_v49 }
 0x420   :  { %v617_v54 = vadd.f32 %v609_v23, %v401_v49  ;;  %v610_v58 = vmul.f32 %v581_v53, %v3175_v57 }
 0x421   :  { %v620_v62 = vadd.f32 %v612_v55, %v401_v49  ;;  %v627_v1 = vmax.f32 %v619_v59, 0.0 }
 0x422   :  { %v625_v60 = vmax.f32 %v617_v54, 0.0  ;;  %v618_v61 = vadd.f32 %v610_v58, %v401_v49 }
 0x423   :  { %v628_v13 = vmax.f32 %v620_v62, 0.0 }
 0x424   :  { %v626_v63 = vmax.f32 %v618_v61, 0.0  ;;  %v2571_v0 = vpop.f32.mrb[12].mxu0  ;;  %2581 = vmatprep.mubr.msk.f32.mxu1 %vm402_vm2, %v625_v60  ;;  %v1129_v60 = vpop.permute.xlu0 %1128 }
 0x425   :  { %v615_v2 = vmul.f32 %v2571_v0, %v3189_v11  ;;  %v594_v5 = vpop.f32.mrb[13].mxu0  ;;  %v3316_v61 = vpop.permute.xlu1 %1131  ;;  %vm1151_vm7 = vcmp.eq.s32.totalorder %v1129_v60, 1 }
 0x426   :  { %v613_v6 = vmul.f32 %v594_v5, %v3183_v4  ;;  %v2572_v7 = vpop.f32.mrb[14].mxu0  ;;  %2582 = vmatmul.mubr.msk.f32.vlgmr.msra.gmra.mrb[16].mxu1 %vm402_vm2, %v626_v63  ;;  %vm1152_vm6 = vcmp.eq.s32.totalorder %v3316_v61, 1 }
 0x427   :  { %v597_v8 = vpop.f32.mrb[15].mxu0  ;;  %2584 = vmatprep.mubr.msk.f32.mxu1 %vm402_vm2, %v627_v1  ;;  %2775 = vmatpush3.bf16.msra.mxu1 %v3000_v9  ;;  %v616_v15 = vmul.f32 %v2572_v7, %v3187_v10  ;;  %v623_v20 = vadd.f32 %v615_v2, %v401_v49 }
 0x428   :  { %v621_v14 = vadd.f32 %v613_v6, %v401_v49  ;;  %v614_v19 = vmul.f32 %v597_v8, %v3181_v3  ;;  %2776 = vmatprep.subr.bf16.mxu1 %v2998_v44  ;;  %v1135_v62 = vpop.permute.xlu0 %1134  ;;  %v3333_v8 = vld [vmem:[%s3672_s8 + $0x2] ss:$0 sm:$0xff] }
 0x429   :  { %v624_v24 = vadd.f32 %v616_v15, %v401_v49  ;;  %v631_v27 = vmax.f32 %v623_v20, 0.0  ;;  %v1138_v63 = vpop.permute.xlu1 %1137  ;;  %vm1153_vm10 = vcmp.eq.s32.totalorder %v1135_v62, 1 }
 0x42a   :  { %v629_v21 = vmax.f32 %v621_v14, 0.0  ;;  %v622_v22 = vadd.f32 %v614_v19, %v401_v49  ;;  %2585 = vmatmul.mubr.msk.f32.gmra.mrb[18].mxu1 %vm402_vm2, %v628_v13  ;;  %vm1154_vm9 = vcmp.eq.s32.totalorder %v1138_v63, 1  ;;  %v3338_v19 = vld [vmem:[#allocation2 + $0xe8] sm:$0xff] }
 0x42b   :  { %2777 = vmatpush3.bf16.msra.mxu1 %v3000_v9  ;;  %v632_v29 = vmax.f32 %v624_v24, 0.0  ;;  %v3347_v24 = vld [vmem:[#allocation2 + $0xe0] sm:$0xff] }
 0x42c   :  { %v630_v25 = vmax.f32 %v622_v22, 0.0  ;;  %2587 = vmatprep.mubr.msk.f32.mxu1 %vm402_vm2, %v629_v21  ;;  %2778 = vmatprep.subr.bf16.mxu1 %v2998_v44  ;;  %v3318_v0 = vpop.permute.xlu0 %1140 }
 0x42d   :  { %vm1155_vm3 = vcmp.eq.s32.totalorder %v3318_v0, 1 }
 0x42e   :  { %2588 = vmatmul.mubr.msk.f32.gmra.mrb[20].mxu1 %vm402_vm2, %v630_v25  ;;  %v3349_v25 = vld [vmem:[#allocation2 + $0xf0] sm:$0xff] }
 0x42f   :  { %2590 = vmatprep.mubr.msk.f32.mxu1 %vm402_vm2, %v631_v27  ;;  %2779 = vmatpush3.bf16.msra.mxu1 %v3000_v9 }
 0x430   :  { %2780 = vmatprep.subr.bf16.mxu1 %v2998_v44 }
 0x432   :  { %2591 = vmatmul.mubr.msk.f32.gmra.mrb[22].mxu1 %vm402_vm2, %v632_v29 }
 0x433   :  { %2781 = vmatpush3.bf16.msra.mxu1 %v3000_v9  ;;  %2625 = vmatprep.mubr.msk.f32.mxu1 %vm3001_vm4, %v2999_v45 }
 0x434   :  { %2794 = vmatprep.subr.bf16.mxu1 %v2998_v44 }
 0x436   :  { %2626 = vmatmul.mubr.msk.f32.vlgmr.msra.gmra.mrb[24].mxu1 %vm173_vm8, %v3292_v30 }
 0x437   :  { %2663 = vmatprep.mubr.msk.f32.mxu1 %vm3001_vm4, %v2999_v45 }
 0x4f9   :  { %v2583_v31 = vpop.f32.mrb[16].mxu1 }
 0x4fa   :  { %v768_v32 = vmul.f32 %v2583_v31, %v3175_v57  ;;  %v728_v33 = vpop.f32.mrb[17].mxu1 }
 0x4fb   :  { %v767_v34 = vmul.f32 %v728_v33, %v3165_v47  ;;  %v3363_v33 = vld [vmem:[#allocation2 + $0x118] sm:$0xff] }
 0x4fd   :  { %v775_v35 = vpack.c.bf16 %v768_v32, %v767_v34  ;;  %v2586_v36 = vpop.f32.mrb[18].mxu1  ;;  %v3361_v32 = vld [vmem:[#allocation2 + $0x108] sm:$0xff] }
 0x4fe   :  { %v770_v37 = vmul.f32 %v2586_v36, %v3173_v56  ;;  %v738_v38 = vpop.f32.mrb[19].mxu1  ;;  %v2808_v36 = vpack.c.bf16 %v3349_v25, %v3347_v24 }
 0x4ff   :  { %v769_v39 = vmul.f32 %v738_v38, %v3163_v46  ;;  %2593 = vmatprep.subr.bf16.mxu0 %v775_v35 }
 0x500   :  { %2594 = vmatpush3.bf16.msra.mxu0 %v775_v35 }
 0x501   :  { %v776_v40 = vpack.c.bf16 %v770_v37, %v769_v39  ;;  %v2589_v41 = vpop.f32.mrb[20].mxu1 }
 0x502   :  { %v772_v42 = vmul.f32 %v2589_v41, %v3181_v3  ;;  %v748_v43 = vpop.f32.mrb[21].mxu1 }
 0x503   :  { %v771_v48 = vmul.f32 %v748_v43, %v3183_v4  ;;  %2595 = vmatprep.subr.bf16.mxu0 %v776_v40 }
 0x504   :  { %2596 = vmatpush3.bf16.msra.mxu0 %v776_v40 }
 0x505   :  { %v777_v49 = vpack.c.bf16 %v772_v42, %v771_v48  ;;  %v2592_v50 = vpop.f32.mrb[22].mxu1  ;;  %v2810_v48 = vpack.c.bf16 %v3363_v33, %v3361_v32 }
 0x506   :  { %v774_v51 = vmul.f32 %v2592_v50, %v3187_v10  ;;  %v758_v23 = vpop.f32.mrb[23].mxu1 }
 0x507   :  { %v773_v52 = vmul.f32 %v758_v23, %v3189_v11  ;;  %2597 = vmatprep.subr.bf16.mxu0 %v777_v49 }
 0x508   :  { %2598 = vmatpush3.bf16.msra.mxu0 %v777_v49 }
 0x509   :  { %v778_v53 = vpack.c.bf16 %v774_v51, %v773_v52  ;;  %v947_v54 = vpop.f32.mrb[24].mxu1 }
 0x50a   :  { %2943 = vrcp.f32 %v947_v54  ;;  %v2627_v55 = vpop.f32.mrb[25].mxu1  ;;  %vm1091_vm5 = vcmp.gt.f32.partialorder %v947_v54, 0.0 }
 0x50b   :  { %2599 = vmatprep.subr.bf16.mxu0 %v778_v53 }
 0x50c   :  { %2600 = vmatpush3.bf16.msra.mxu0 %v778_v53 }
 0x50d   :  { %2782 = vmatprep.subr.bf16.mxu0 %v2998_v44 }
 0x50f   :  { %2602 = vmatmul.mubr.msk.bf16.vlgmr.msra.gmra.mrb[16].mxu0 %vm173_vm8, %v3196_v16  ;;  %v3320_v16 = vpop.permute.xlu1 %1143 }
 0x510   :  { %2605 = vmatprep.mubr.msk.bf16.mxu0 %vm173_vm8, %v3201_v17  ;;  %v3322_v17 = vpop.permute.xlu0 %1146 }
 0x511   :  { %vm1157_vm15 = vcmp.eq.s32.totalorder %v3322_v17, 1 }
 0x513   :  { %v3324_v1 = vpop.permute.xlu1 %1149 }
 0x514   :  { %v2944_v58 = vpop.eup %2943  ;;  %v1235_v2 = vpop.permute.xlu0 %1234 }
 0x515   :  { %v1093_v59 = vsel %vm1091_vm5, %v2944_v58, 0.0  ;;  %vm1257_vm12 = vcmp.eq.s32.totalorder %v1235_v2, 1 }
 0x516   :  { %1096 = vperm.xlu0 %2937, %v1093_v59  }
 0x517   :  { %2606 = vmatmul.mubr.msk.bf16.gmra.mrb[20].mxu0 %vm173_vm8, %v3210_v18  ;;  %v3326_v5 = vpop.permute.xlu1 %1237 }
 0x518   :  { %2644 = vmatprep.mubr.msk.f32.mxu0 %vm3001_vm4, %v2999_v45  ;;  %v1241_v18 = vpop.permute.xlu0 %1240  ;;  %vm1258_vm11 = vcmp.eq.s32.totalorder %v3326_v5, 1 }
 0x519   :  { %vm1259_vm13 = vcmp.eq.s32.totalorder %v1241_v18, 1 }
 0x51b   :  { %v1244_v6 = vpop.permute.xlu1 %1243 }
 0x51c   :  { %v3328_v7 = vpop.permute.xlu0 %1246  ;;  %vm1260_vm14 = vcmp.eq.s32.totalorder %v1244_v6, 1 }
 0x51d   :  { %vm1261_vm5 = vcmp.eq.s32.totalorder %v3328_v7, 1 }
 0x51f   :  { %v3353_v28 = vpop.permute.xlu1 %1249 }
 0x520   :  { %v3365_v34 = vpop.permute.xlu0 %1252 }
 0x521   :  { %vm1263_vm0 = vcmp.eq.s32.totalorder %v3365_v34, 1 }
 0x523   :  { %v3407_v58 = vpop.permute.xlu1 %1255 }
 0x5e2   :  { %v2603_v9 = vpop.f32.mrb[16].mxu0 }
 0x5e3   :  { %v846_v12 = vmul.f32 %v2603_v9, %v3163_v46  ;;  %v813_v13 = vpop.f32.mrb[17].mxu0  ;;  %v3345_v46 = vld [vmem:[#allocation2 + $0xf8] sm:$0xff] }
 0x5e4   :  { %v844_v14 = vmul.f32 %v813_v13, %v3165_v47  ;;  %v2604_v15 = vpop.f32.mrb[18].mxu0  ;;  %v2806_v35 = vpack.c.bf16 %v3345_v46, %v3338_v19 }
 0x5e5   :  { %v3342_v20 = vadd.f32 %v846_v12, %v3333_v8  ;;  %v847_v21 = vmul.f32 %v2604_v15, %v3173_v56  ;;  %v816_v22 = vpop.f32.mrb[19].mxu0 }
 0x5e6   :  { %v852_v47 = vadd.f32 %v844_v14, %v3333_v8  ;;  %v845_v27 = vmul.f32 %v816_v22, %v3175_v57 }
 0x5e7   :  { %v1161_v29 = vsel %vm1153_vm10, %v3342_v20, -1e+30  ;;  %v1267_v56 = vsel %vm1259_vm13, %v3342_v20, -1e+30  ;;  %v3359_v31 = vadd.f32 %v847_v21, %v3333_v8  ;;  %v1190_v57 = vsel %vm1153_vm10, %v3342_v20, 1e+30 }
 0x5e8   :  { %v3374_v37 = vsel %vm402_vm2, %v1161_v29, -inf  ;;  %v1296_v38 = vsel %vm1259_vm13, %v3342_v20, 1e+30  ;;  %v1159_v39 = vsel %vm1151_vm7, %v852_v47, -1e+30  ;;  %v853_v40 = vadd.f32 %v845_v27, %v3333_v8 }
 0x5e9   :  { %v1188_v41 = vsel %vm1151_vm7, %v852_v47, 1e+30  ;;  %v1265_v42 = vsel %vm1257_vm12, %v852_v47, -1e+30  ;;  %v1294_v43 = vsel %vm1257_vm12, %v852_v47, 1e+30  ;;  %v870_v29 = vmul.f32 %v852_v47, %v852_v47 }
 0x5ea   :  { %v3387_v49 = vsel %vm402_vm2, %v1190_v57, inf  ;;  %v3390_v50 = vsel %vm402_vm2, %v1267_v56, -inf  ;;  %v1162_v51 = vsel %vm1154_vm9, %v3359_v31, -1e+30  ;;  %v1191_v23 = vsel %vm1154_vm9, %v3359_v31, 1e+30 }
 0x5eb   :  { %v3397_v52 = vsel %vm402_vm2, %v1296_v38, inf  ;;  %v3400_v53 = vsel %vm402_vm2, %v1159_v39, -inf  ;;  %v1268_v54 = vsel %vm1260_vm14, %v3359_v31, -1e+30  ;;  %v1297_v55 = vsel %vm1260_vm14, %v3359_v31, 1e+30 }
 0x5ec   :  { %v3410_v59 = vsel %vm402_vm2, %v1188_v41, inf  ;;  %v3413_v60 = vsel %vm402_vm2, %v1265_v42, -inf  ;;  %v3416_v62 = vsel %vm402_vm2, %v1294_v43, inf  ;;  %v1160_v63 = vsel %vm1152_vm6, %v853_v40, -1e+30  ;;  %v2607_v15 = vpop.f32.mrb[20].mxu0 }
 0x5ed   :  { %v3422_v2 = vsel %vm402_vm2, %v1162_v51, -inf  ;;  %v3425_v18 = vsel %vm402_vm2, %v1191_v23, inf  ;;  %v3428_v6 = vsel %vm402_vm2, %v1268_v54, -inf  ;;  %v3432_v9 = vsel %vm1258_vm11, %v853_v40, -1e+30  ;;  %v829_v27 = vpop.f32.mrb[21].mxu0 }
 0x5ee   :  { %vm1158_vm7 = vcmp.eq.s32.totalorder %v3324_v1, 1  ;;  %v3436_v12 = vsel %vm402_vm2, %v1297_v55, inf  ;;  %v1189_v13 = vsel %vm1152_vm6, %v853_v40, 1e+30  ;;  %v1295_v14 = vsel %vm1258_vm11, %v853_v40, 1e+30 }
 0x5ef   :  { %v2783_v21 = vpack.c.bf16 %v853_v40, %v852_v47  ;;  %vm1264_vm9 = vcmp.eq.s32.totalorder %v3407_v58, 1  ;;  %v850_v22 = vmul.f32 %v2607_v15, %v3189_v11  ;;  %v871_v56 = vmul.f32 %v853_v40, %v853_v40  ;;  %v2608_v38 = vpop.f32.mrb[22].mxu0 }
 0x5f0   :  { %v2786_v57 = vpack.c.bf16 %v3359_v31, %v3342_v20  ;;  %vm1156_vm10 = vcmp.eq.s32.totalorder %v3320_v16, 1  ;;  %v3448_v61 = vsel %vm402_vm2, %v1160_v63, -inf  ;;  %v848_v5 = vmul.f32 %v829_v27, %v3183_v4  ;;  %v832_v42 = vpop.f32.mrb[23].mxu0 }
 0x5f1   :  { %2784 = vmatpush3.bf16.msra.mxu0 %v2783_v21  ;;  %v872_v39 = vmul.f32 %v3342_v20, %v3342_v20  ;;  %v873_v11 = vmul.f32 %v3359_v31, %v3359_v31  ;;  %vm1262_vm6 = vcmp.eq.s32.totalorder %v3353_v28, 1  ;;  %v3457_v47 = vsel %vm402_vm2, %v1189_v13, inf }
 0x5f2   :  { %v3460_v40 = vadd.f32 %v850_v22, %v3333_v8  ;;  %v851_v41 = vmul.f32 %v2608_v38, %v3187_v10  ;;  %v2795_v4 = vpack.c.bf16 %v871_v56, %v870_v29  ;;  %2785 = vmatprep.subr.bf16.mxu0 %v2998_v44  ;;  %v3465_v43 = vsel %vm402_vm2, %v1295_v14, inf }
 0x5f3   :  { %v856_v20 = vadd.f32 %v848_v5, %v3333_v8  ;;  %v849_v31 = vmul.f32 %v832_v42, %v3181_v3  ;;  %v2798_v51 = vpack.c.bf16 %v873_v11, %v872_v39  ;;  %vm1323_vm11 = vcmask 1040384  }
 0x5f4   :  { %v1165_v23 = vsel %vm1157_vm15, %v3460_v40, -1e+30  ;;  %v1194_v10 = vsel %vm1157_vm15, %v3460_v40, 1e+30  ;;  %v1271_v54 = vsel %vm1263_vm0, %v3460_v40, -1e+30  ;;  %v3479_v55 = vadd.f32 %v851_v41, %v3333_v8  ;;  %2796 = vmatpush3.bf16.msra.mxu1 %v2795_v4 }
 0x5f5   :  { %v3482_v63 = vsel %vm402_vm2, %v1165_v23, -inf  ;;  %v1204_v3 = vsel %vm402_vm2, %v1194_v10, inf  ;;  %v3486_v13 = vsel %vm402_vm2, %v1271_v54, -inf  ;;  %v1300_v17 = vsel %vm1263_vm0, %v3460_v40, 1e+30  ;;  %2787 = vmatpush3.bf16.msra.mxu0 %v2786_v57  ;;  %2797 = vmatprep.subr.bf16.mxu1 %v2998_v44 }
 0x5f6   :  { %v1310_v14 = vsel %vm402_vm2, %v1300_v17, inf  ;;  %v1163_v15 = vsel %vm1155_vm3, %v856_v20, -1e+30  ;;  %v1192_v21 = vsel %vm1155_vm3, %v856_v20, 1e+30  ;;  %v857_v22 = vadd.f32 %v849_v31, %v3333_v8  ;;  %2788 = vmatprep.subr.bf16.mxu0 %v2998_v44 }
 0x5f7   :  { %v1171_v27 = vsel %vm402_vm2, %v1163_v15, -inf  ;;  %v1200_v34 = vsel %vm402_vm2, %v1192_v21, inf  ;;  %v1269_v29 = vsel %vm1261_vm5, %v856_v20, -1e+30  ;;  %v1298_v56 = vsel %vm1261_vm5, %v856_v20, 1e+30 }
 0x5f8   :  { %v3506_v57 = vsel %vm402_vm2, %v1269_v29, -inf  ;;  %v1306_v0 = vsel %vm402_vm2, %v1298_v56, inf  ;;  %v1166_v8 = vsel %vm1158_vm7, %v3479_v55, -1e+30  ;;  %v1195_v5 = vsel %vm1158_vm7, %v3479_v55, 1e+30  ;;  %2799 = vmatpush3.bf16.msra.mxu1 %v2798_v51 }
 0x5f9   :  { %v1177_v38 = vsel %vm402_vm2, %v1166_v8, -inf  ;;  %v1206_v39 = vsel %vm402_vm2, %v1195_v5, inf  ;;  %v1272_v7 = vsel %vm1264_vm9, %v3479_v55, -1e+30  ;;  %v1301_v11 = vsel %vm1264_vm9, %v3479_v55, 1e+30  ;;  %2800 = vmatprep.subr.bf16.mxu1 %v2998_v44 }
 0x5fa   :  { %v3525_v41 = vsel %vm402_vm2, %v1272_v7, -inf  ;;  %v1312_v1 = vsel %vm402_vm2, %v1301_v11, inf  ;;  %v1164_v42 = vsel %vm1156_vm10, %v857_v22, -1e+30  ;;  %v1193_v4 = vsel %vm1156_vm10, %v857_v22, 1e+30 }
 0x5fb   :  { %v1173_v31 = vsel %vm402_vm2, %v1164_v42, -inf  ;;  %v1202_v51 = vsel %vm402_vm2, %v1193_v4, inf  ;;  %v1270_v58 = vsel %vm1262_vm6, %v857_v22, -1e+30  ;;  %v1299_v23 = vsel %vm1262_vm6, %v857_v22, 1e+30 }
 0x5fc   :  { %v1279_v10 = vsel %vm402_vm2, %v1270_v58, -inf  ;;  %v1308_v54 = vsel %vm402_vm2, %v1299_v23, inf  ;;  %v2789_v17 = vpack.c.bf16 %v857_v22, %v856_v20  ;;  %v874_v15 = vmul.f32 %v856_v20, %v856_v20 }
 0x5fd   :  { %v875_v21 = vmul.f32 %v857_v22, %v857_v22  ;;  %v2792_v16 = vpack.c.bf16 %v3479_v55, %v3460_v40  ;;  %v876_v29 = vmul.f32 %v3460_v40, %v3460_v40  ;;  %v877_v56 = vmul.f32 %v3479_v55, %v3479_v55 }
 0x5fe   :  { %2790 = vmatpush3.bf16.msra.mxu0 %v2789_v17  ;;  %v1201_v28 = vmin.f32 %v3410_v59, %v1200_v34  ;;  %v1203_v8 = vmin.f32 %v3457_v47, %v1202_v51  ;;  %v1205_v5 = vmin.f32 %v3387_v49, %v1204_v3  ;;  %v1207_v7 = vmin.f32 %v3425_v18, %v1206_v39  ;;  %v1345_v34 = vld [vmem:[#allocation2 + $0x110] sm:$0xff]  ;;  %v1334_v39 = vld [vmem:[#allocation2 + $0xb8] sm:$0xff] }
 0x5ff   :  { %v2801_v20 = vpack.c.bf16 %v875_v21, %v874_v15  ;;  %2791 = vmatprep.subr.bf16.mxu0 %v2998_v44  ;;  %v2804_v22 = vpack.c.bf16 %v877_v56, %v876_v29  ;;  %v1307_v11 = vmin.f32 %v3416_v62, %v1306_v0  ;;  %v1309_v40 = vmin.f32 %v3465_v43, %v1308_v54  ;;  %v1343_v43 = vld [vmem:[#allocation2 + $0x100] sm:$0xff]  ;;  %v1332_v0 = vld [vmem:[#allocation2 + $0xa8] sm:$0xff]  ;;  %v1333_v17 = vld [vmem:[#allocation2 + $0xb0] sm:$0xff] }
 0x600   :  { %v1208_v42 = vmin.f32 %v1201_v28, %v1203_v8  ;;  %v1209_v4 = vmin.f32 %v1205_v5, %v1207_v7  ;;  %v1311_v55 = vmin.f32 %v3397_v52, %v1310_v14  ;;  %v1313_v59 = vmin.f32 %v3436_v12, %v1312_v1  ;;  %v1336_v21 = vld [vmem:[#allocation2 + $0xc8] sm:$0xff] }
 0x601   :  { %2802 = vmatpush3.bf16.msra.mxu1 %v2801_v20  ;;  %v1314_v47 = vmin.f32 %v1307_v11, %v1309_v40  ;;  %v1172_v49 = vmax.f32 %v3400_v53, %v1171_v27  ;;  %v1174_v18 = vmax.f32 %v3448_v61, %v1173_v31  ;;  %v1176_v3 = vmax.f32 %v3374_v37, %v3482_v63 }
 0x602   :  { %v1274_v62 = vsel %vm402_vm2, %v3432_v9, -inf  ;;  %2793 = vmatpush3.bf16.msra.mxu0 %v2792_v16  ;;  %2803 = vmatprep.subr.bf16.mxu1 %v2998_v44  ;;  %v1210_v52 = vmin.f32 %v1208_v42, %v1209_v4  ;;  %v1315_v14 = vmin.f32 %v1311_v55, %v1313_v59  ;;  %v1178_v12 = vmax.f32 %v3422_v2, %v1177_v38  ;;  %v1338_v16 = vld [vmem:[#allocation2 + $0xd8] sm:$0xff]  ;;  %v1335_v55 = vld [vmem:[#allocation2 + $0xc0] sm:$0xff]  ;;  %v1337_v59 = vld [vmem:[#allocation2 + $0xd0] sm:$0xff] }
 0x603   :  { %2807 = vmatprep.subr.bf16.mxu0 %v2806_v35  ;;  %v1179_v53 = vmax.f32 %v1172_v49, %v1174_v18  ;;  %v1278_v37 = vmax.f32 %v3413_v60, %v3506_v57  ;;  %v1280_v61 = vmax.f32 %v1274_v62, %v1279_v10  ;;  %v1282_v9 = vmax.f32 %v3390_v50, %v3486_v13  ;;  %v1496_v49 = vld [vmem:[#allocation2 + $0x128] sm:$0xff]  ;;  %v1498_v18 = vld [vmem:[#allocation2 + $0x138] sm:$0xff]  ;;  %v1694_v62 = vld [vmem:[#allocation2 + $0x2a0] sm:$0xff] }
 0x604   :  { %v1211_v63 = vrot.slane %v1210_v52, 4  ;;  %v1316_v27 = vmin.f32 %v1314_v47, %v1315_v14  ;;  %v1180_v1 = vmax.f32 %v1176_v3, %v1178_v12  ;;  %v1284_v2 = vmax.f32 %v3428_v6, %v3525_v41  ;;  %v1679_v14 = vld [vmem:[#allocation2 + $0x1b0] sm:$0xff]  ;;  %v1696_v12 = vld [vmem:[#allocation2 + $0x2c0] sm:$0xff] }
 0x605   :  { %2805 = vmatpush3.bf16.msra.mxu1 %v2804_v22  ;;  %2645 = vmatmul.mubr.msk.f32.vlgmr.msra.gmra.mrb[24].mxu0 %vm173_vm8, %v3292_v30  ;;  %v2812_v19 = vpack.c.bf16 %v1345_v34, %v1343_v43  ;;  %v1285_v46 = vmax.f32 %v1278_v37, %v1280_v61  ;;  %v2814_v6 = vpack.c.bf16 %v1334_v39, %v1332_v0  ;;  %vm1325_vm12 = vcmask 1041408   ;;  %v1695_v43 = vld [vmem:[#allocation2 + $0x2b0] sm:$0xff]  ;;  %v1678_v34 = vld [vmem:[#allocation2 + $0x1a0] sm:$0xff] }
 0x606   :  { %2809 = vmatpush1.bf16.msra.mxu0 %v2808_v36  ;;  %1414 = vmatprep.mubr.f32.mxu0 %v2999_v45  ;;  %v1212_v35 = vmin.f32 %v1210_v52, %v1211_v63  ;;  %v1317_v50 = vrot.slane %v1316_v27, 4  ;;  %v1181_v60 = vmax.f32 %v1179_v53, %v1180_v1  ;;  %v1286_v13 = vmax.f32 %v1282_v9, %v1284_v2  ;;  %v1697_v53 = vld [vmem:[#allocation2 + $0x2d0] sm:$0xff]  ;;  %v1680_v9 = vld [vmem:[#allocation2 + $0x1c0] sm:$0xff] }
 0x607   :  { %2811 = vmatprep.subr.bf16.mxu0 %v2810_v48  ;;  %v1331_v48 = vld [vmem:[#allocation2 + $0xa0] sm:$0xff]  ;;  %v2818_v7 = vpack.c.bf16 %v1338_v16, %v1336_v21  ;;  %v2820_v47 = vpack.c.bf16 %v1337_v59, %v1335_v55  ;;  %v2822_v3 = vpack.c.bf16 %v1498_v18, %v1496_v49  ;;  %v2838_v52 = vpack.c.bf16 %v1695_v43, %v1694_v62  ;;  %v1681_v63 = vld [vmem:[#allocation2 + $0x1d0] sm:$0xff]  ;;  %v1500_v21 = vld [vmem:[#allocation2 + $0x148] sm:$0xff] }
 0x608   :  { %2664 = vmatmul.mubr.msk.f32.vlgmr.msra.gmra.mrb[26].mxu1 %vm173_vm8, %v3292_v30  ;;  %v1213_v57 = vrot.slane %v1212_v35, 2  ;;  %v1318_v38 = vmin.f32 %v1316_v27, %v1317_v50  ;;  %v1182_v41 = vrot.slane %v1181_v60, 4  ;;  %v1287_v31 = vmax.f32 %v1285_v46, %v1286_v13  ;;  %v1698_v27 = vld [vmem:[#allocation2 + $0x2e0] sm:$0xff]  ;;  %v1699_v0 = vld [vmem:[#allocation2 + $0x2f0] sm:$0xff]  ;;  %v1502_v16 = vld [vmem:[#allocation2 + $0x158] sm:$0xff] }
 0x609   :  { %v2816_v8 = vpack.c.bf16 %v1333_v17, %v1331_v48  ;;  %v2840_v37 = vpack.c.bf16 %v1679_v14, %v1678_v34  ;;  %v2842_v61 = vpack.c.bf16 %v1697_v53, %v1696_v12  ;;  %2839 = vmatprep.subr.bf16.mxu1 %v2838_v52  ;;  %v2844_v39 = vpack.c.bf16 %v1681_v63, %v1680_v9  ;;  %v1682_v2 = vld [vmem:[#allocation2 + $0x1e0] sm:$0xff]  ;;  %v1581_v62 = vld [vmem:[#allocation2 + $0x170] sm:$0xff]  ;;  %v1584_v34 = vld [vmem:[#allocation2 + $0x188] sm:$0xff] }
 0x60a   :  { %2813 = vmatpush1.bf16.msra.mxu0 %v2812_v19  ;;  %v1214_v24 = vmin.f32 %v1212_v35, %v1213_v57  ;;  %v1319_v25 = vrot.slane %v1318_v38, 2  ;;  %v1183_v36 = vmax.f32 %v1181_v60, %v1182_v41  ;;  %v1288_v51 = vrot.slane %v1287_v31, 4  ;;  %v1683_v19 = vld [vmem:[#allocation2 + $0x1f0] sm:$0xff]  ;;  %v1700_v46 = vld [vmem:[#allocation2 + $0x300] sm:$0xff]  ;;  %v1586_v52 = vld [vmem:[#allocation2 + $0x198] sm:$0xff] }
 0x60b   :  { %2815 = vmatprep.subr.bf16.mxu0 %v2814_v6  ;;  %2841 = vmatpush3.bf16.msra.mxu1 %v2840_v37  ;;  %v2846_v1 = vpack.c.bf16 %v1699_v0, %v1698_v27  ;;  %v1701_v35 = vld [vmem:[#allocation2 + $0x310] sm:$0xff]  ;;  %v2848_v50 = vpack.c.bf16 %v1683_v19, %v1682_v2  ;;  %v1684_v13 = vld [vmem:[#allocation2 + $0x200] sm:$0xff]  ;;  %v2834_v12 = vpack.c.bf16 %v1586_v52, %v1584_v34  ;;  %vm1881_vm13 = vcmask 64512  }
 0x60c   :  { %v1215_v58 = vrot.slane %v1214_v24, 1  ;;  %v1320_v23 = vmin.f32 %v1318_v38, %v1319_v25  ;;  %v1184_v10 = vrot.slane %v1183_v36, 2  ;;  %v1289_v54 = vmax.f32 %v1287_v31, %v1288_v51  ;;  %2843 = vmatprep.subr.bf16.mxu1 %v2842_v61  ;;  %v1685_v6 = vld [vmem:[#allocation2 + $0x210] sm:$0xff]  ;;  %v1702_v57 = vld [vmem:[#allocation2 + $0x320] sm:$0xff] }
 0x60d   :  { %v2850_v60 = vpack.c.bf16 %v1701_v35, %v1700_v46  ;;  %v1703_v38 = vld [vmem:[#allocation2 + $0x330] sm:$0xff]  ;;  %v2852_v41 = vpack.c.bf16 %v1685_v6, %v1684_v13  ;;  %v1583_v53 = vld [vmem:[#allocation2 + $0x180] sm:$0xff] }
 0x60e   :  { %v1216_v32 = vmin.f32 %v1214_v24, %v1215_v58  ;;  %v1321_v33 = vrot.slane %v1320_v23, 1  ;;  %v1185_v15 = vmax.f32 %v1183_v36, %v1184_v10  ;;  %v1290_v30 = vrot.slane %v1289_v54, 2  ;;  %v1686_v24 = vld [vmem:[#allocation2 + $0x220] sm:$0xff]  ;;  %v1687_v25 = vld [vmem:[#allocation2 + $0x230] sm:$0xff] }
 0x60f   :  { %2845 = vmatpush3.bf16.msra.mxu1 %v2844_v39  ;;  %v2854_v31 = vpack.c.bf16 %v1703_v38, %v1702_v57  ;;  %v1704_v36 = vld [vmem:[#allocation2 + $0x340] sm:$0xff]  ;;  %v1705_v51 = vld [vmem:[#allocation2 + $0x350] sm:$0xff]  ;;  %v2856_v58 = vpack.c.bf16 %v1687_v25, %v1686_v24 }
 0x610   :  { %v1322_v29 = vmin.f32 %v1320_v23, %v1321_v33  ;;  %v1186_v56 = vrot.slane %v1185_v15, 1  ;;  %v1291_v28 = vmax.f32 %v1289_v54, %v1290_v30  ;;  %2847 = vmatprep.subr.bf16.mxu1 %v2846_v1  ;;  %v2858_v23 = vpack.c.bf16 %v1705_v51, %v1704_v36  ;;  %v1688_v10 = vld [vmem:[#allocation2 + $0x240] sm:$0xff]  ;;  %v1689_v54 = vld [vmem:[#allocation2 + $0x250] sm:$0xff] }
 0x611   :  { %v1707_v33 = vld [vmem:[#allocation2 + $0x370] sm:$0xff]  ;;  %v2860_v48 = vpack.c.bf16 %v1689_v54, %v1688_v10  ;;  %v1690_v9 = vld [vmem:[#allocation2 + $0x260] sm:$0xff] }
 0x612   :  { %v1324_v5 = vsel %vm1323_vm11, %v1216_v32, %v1322_v29  ;;  %v1187_v20 = vmax.f32 %v1185_v15, %v1186_v56  ;;  %v1292_v22 = vrot.slane %v1291_v28, 1  ;;  %v1706_v32 = vld [vmem:[#allocation2 + $0x360] sm:$0xff]  ;;  %v1497_v30 = vld [vmem:[#allocation2 + $0x130] sm:$0xff]  ;;  %v1097_v29 = vpop.permute.xlu0 %1096 }
 0x613   :  { %v1326_v11 = vsel %vm1325_vm12, %v1324_v5, 0.0  ;;  %2849 = vmatpush3.bf16.msra.mxu1 %v2848_v50  ;;  %v2862_v17 = vpack.c.bf16 %v1707_v33, %v1706_v32  ;;  %v1495_v15 = vld [vmem:[#allocation2 + $0x120] sm:$0xff]  ;;  %v1585_v37 = vld [vmem:[#allocation2 + $0x190] sm:$0xff]  ;;  %v1666_v32 = vsub.s32 0, %v3279_v26 }
 0x614   :  { %2335 = vmatmul.mubr.msk.f32.vlgmr.msra.gmra.mrb[26].mxu0 %vm402_vm2, %v1326_v11  ;;  %v1293_v40 = vmax.f32 %v1291_v28, %v1292_v22  ;;  %2851 = vmatprep.subr.bf16.mxu1 %v2850_v60  ;;  %v2824_v28 = vpack.c.bf16 %v1497_v30, %v1495_v15  ;;  %v1501_v22 = vld [vmem:[#allocation2 + $0x150] sm:$0xff]  ;;  %v1580_v11 = vld [vmem:[#allocation2 + $0x168] sm:$0xff]  ;;  %v2836_v61 = vpack.c.bf16 %v1585_v37, %v1583_v53  ;;  %v1708_v0 = vld [vmem:[#allocation2 + $0x380] sm:$0xff] }
 0x615   :  { %2817 = vmatpush1.bf16.msra.mxu0 %v2816_v8  ;;  %1488 = vmatprep.mubr.f32.mxu0 %v2999_v45  ;;  %v1691_v63 = vld [vmem:[#allocation2 + $0x270] sm:$0xff]  ;;  %v1692_v1 = vld [vmem:[#allocation2 + $0x280] sm:$0xff] }
 0x616   :  { %2819 = vmatprep.subr.bf16.mxu0 %v2818_v7  ;;  %v1327_v42 = vsel %vm1323_vm11, %v1187_v20, %v1293_v40  ;;  %v2826_v7 = vpack.c.bf16 %v1502_v16, %v1500_v21  ;;  %v1499_v20 = vld [vmem:[#allocation2 + $0x140] sm:$0xff]  ;;  %v1582_v40 = vld [vmem:[#allocation2 + $0x178] sm:$0xff]  ;;  %v2864_v27 = vpack.c.bf16 %v1691_v63, %v1690_v9  ;;  %v1709_v39 = vld [vmem:[#allocation2 + $0x390] sm:$0xff] }
 0x617   :  { %v3587_v4 = vsel %vm1325_vm12, %v1327_v42, 0.0  ;;  %2853 = vmatpush3.bf16.msra.mxu1 %v2852_v41  ;;  %v2830_v18 = vpack.c.bf16 %v1582_v40, %v1580_v11  ;;  %v1693_v2 = vld [vmem:[#allocation2 + $0x290] sm:$0xff]  ;;  %v1782_v46 = vld [vmem:[#allocation2 + $0x3a0] sm:$0xff] }
 0x618   :  { %2855 = vmatprep.subr.bf16.mxu1 %v2854_v31  ;;  %v2868_v19 = vpack.c.bf16 %v1693_v2, %v1692_v1  ;;  %v1783_v35 = vld [vmem:[#allocation2 + $0x3b0] sm:$0xff]  ;;  %v1784_v50 = vld [vmem:[#allocation2 + $0x3c0] sm:$0xff] }
 0x619   :  { %2821 = vmatpush1.bf16.msra.mxu0 %v2820_v47  ;;  %v2828_v47 = vpack.c.bf16 %v1501_v22, %v1499_v20  ;;  %v2871_v60 = vpack.c.bf16 %v1783_v35, %v1782_v46  ;;  %v1785_v13 = vld [vmem:[#allocation2 + $0x3d0] sm:$0xff]  ;;  %v1786_v57 = vld [vmem:[#allocation2 + $0x3e0] sm:$0xff] }
 0x61a   :  { %2823 = vmatprep.subr.bf16.mxu0 %v2822_v3  ;;  %v1579_v3 = vld [vmem:[#allocation2 + $0x160] sm:$0xff]  ;;  %v2874_v6 = vpack.c.bf16 %v1785_v13, %v1784_v50  ;;  %v1787_v38 = vld [vmem:[#allocation2 + $0x3f0] sm:$0xff] }
 0x61b   :  { %2857 = vmatpush3.bf16.msra.mxu1 %v2856_v58  ;;  %v2832_v14 = vpack.c.bf16 %v1581_v62, %v1579_v3  ;;  %v2877_v41 = vpack.c.bf16 %v1787_v38, %v1786_v57  ;;  %v1788_v31 = vld [vmem:[#allocation2 + $0x400] sm:$0xff]  ;;  %v1789_v24 = vld [vmem:[#allocation2 + $0x410] sm:$0xff] }
 0x61c   :  { %2859 = vmatprep.subr.bf16.mxu1 %v2858_v23  ;;  %v2880_v25 = vpack.c.bf16 %v1789_v24, %v1788_v31  ;;  %v1790_v36 = vld [vmem:[#allocation2 + $0x420] sm:$0xff]  ;;  %v1791_v51 = vld [vmem:[#allocation2 + $0x430] sm:$0xff] }
 0x61d   :  { %v2883_v58 = vpack.c.bf16 %v1791_v51, %v1790_v36  ;;  %v1792_v23 = vld [vmem:[#allocation2 + $0x440] sm:$0xff]  ;;  %v1793_v10 = vld [vmem:[#allocation2 + $0x450] sm:$0xff] }
 0x61e   :  { %v2886_v54 = vpack.c.bf16 %v1793_v10, %v1792_v23  ;;  %v2334_v33 = vld [vmem:[%s3672_s8 + $0x3] ss:$8 sm:$0x3]  ;;  %v1797_v22 = vld [vmem:[#allocation2 + $0x490] sm:$0xff]  ;;  %v1710_v52 = vld [vmem:[%s3672_s8 + $0x4] ss:$0 sm:$0xff] }
 0x61f   :  { %2861 = vmatpush3.bf16.msra.mxu1 %v2860_v48  ;;  %v1670_v48 = vsub.s32 1, %v3279_v26  ;;  %v1880_v11 = vld [vmem:[#allocation2 + $0x520] sm:$0xff]  ;;  %v1876_v62 = vld [vmem:[#allocation2 + $0x4f0] sm:$0xff] }
 0x620   :  { %2863 = vmatprep.subr.bf16.mxu1 %v2862_v17  ;;  %v1667_v17 = vrot.slane %v2334_v33, %v1666_v32  ;;  %v1879_v26 = vld [vmem:[%s3670_s6] sm:$0xff]  ;;  %v1878_v9 = vld [vmem:[#allocation2 + $0x510] sm:$0xff] }
 0x621   :  { %v1671_v15 = vrot.slane %v2334_v33, %v1670_v48  ;;  %v1871_v40 = vld [vmem:[#allocation2 + $0x4a0] sm:$0xff]  ;;  %v2030_v46 = vld [vmem:[#allocation2 + $0x530] sm:$0xff] }
 0x622   :  { %v1875_v3 = vld [vmem:[#allocation2 + $0x4e0] sm:$0xff]  ;;  %v2032_v50 = vld [vmem:[#allocation2 + $0x550] sm:$0xff] }
 0x623   :  { %2865 = vmatpush3.bf16.msra.mxu1 %v2864_v27  ;;  %v2031_v35 = vld [vmem:[#allocation2 + $0x540] sm:$0xff]  ;;  %v2111_v23 = vld [vmem:[#allocation2 + $0x590] sm:$0xff] }
 0x624   :  { %v2033_v13 = vld [vmem:[#allocation2 + $0x560] sm:$0xff] }
 0x625   :  { %v2110_v57 = vld [vmem:[#allocation2 + $0x580] sm:$0xff]  ;;  %v2910_v38 = vpack.c.bf16 %v2033_v13, %v2032_v50 }
 0x626   :  { %v1870_v31 = vld [vmem:[%s3672_s8 + $0x6] ss:$0 sm:$0xff] }
 0x627   :  { %v2112_v10 = vld [vmem:[#allocation2 + $0x5a0] sm:$0xff] }
 0x6d8   :  { %v1017_v56 = vpop.f32.mrb[24].mxu0 }
 0x6d9   :  { %v1099_v8 = vmul.f32 %v1097_v29, %v1017_v56  ;;  %v2646_v5 = vpop.f32.mrb[25].mxu0 }
 0x6da   :  { %v1795_v5 = vld [vmem:[#allocation2 + $0x470] sm:$0xff] }
 0x6db   :  { %v1101_v42 = vmul.f32 %v1099_v8, %v1099_v8  ;;  %v1087_v55 = vpop.f32.mrb[26].mxu1  ;;  %2336 = vmatmul.mubr.msk.f32.vlgmr.msra.gmra.mrb[26].mxu0 %vm402_vm2, %v1099_v8  ;;  %v1794_v8 = vld [vmem:[#allocation2 + $0x460] sm:$0xff] }
 0x6dc   :  { %v1100_v59 = vmul.f32 %v1097_v29, %v1087_v55  ;;  %2825 = vmatpush1.bf16.msra.mxu0 %v2824_v28  ;;  %1570 = vmatprep.mubr.f32.mxu0 %v2999_v45  ;;  %v2665_v49 = vpop.f32.mrb[27].mxu1  ;;  %v2889_v20 = vpack.c.bf16 %v1795_v5, %v1794_v8  ;;  %v1872_v55 = vld [vmem:[#allocation2 + $0x4b0] sm:$0xff] }
 0x6dd   :  { %2827 = vmatprep.subr.bf16.mxu0 %v2826_v7  ;;  %v1796_v7 = vld [vmem:[#allocation2 + $0x480] sm:$0xff]  ;;  %v2190_v5 = vld [vmem:[%s3672_s8 + $0x11] ss:$0 sm:$0xff] }
 0x6de   :  { %v1102_v43 = vsub.f32 %v1100_v59, %v1101_v42  ;;  %v2892_v42 = vpack.c.bf16 %v1797_v22, %v1796_v7  ;;  %v1873_v59 = vld [vmem:[#allocation2 + $0x4c0] sm:$0xff] }
 0x6e0   :  { %2829 = vmatpush1.bf16.msra.mxu0 %v2828_v47  ;;  %v1874_v47 = vld [vmem:[#allocation2 + $0x4d0] sm:$0xff] }
 0x6e1   :  { %2831 = vmatprep.subr.bf16.mxu0 %v2830_v18  ;;  %v2898_v49 = vpack.c.bf16 %v1874_v47, %v1873_v59  ;;  %v2945_v18 = vld [vmem:[#allocation5] sm:$0xff] }
 0x6e3   :  { %2337 = vmatmul.mubr.msk.f32.vlgmr.msra.gmra.mrb[26].mxu0 %vm402_vm2, %v3587_v4  ;;  %v2866_v4 = vpack.c.bf16 %v1709_v39, %v1708_v0  ;;  %v1798_v39 = vld [vmem:[%s3672_s8 + $0x5] ss:$0 sm:$0xff] }
 0x6e4   :  { %2833 = vmatpush1.bf16.msra.mxu0 %v2832_v14  ;;  %1654 = vmatprep.mubr.f32.mxu0 %v2999_v45 }
 0x6e5   :  { %2835 = vmatprep.subr.bf16.mxu0 %v2834_v12  ;;  %2867 = vmatprep.subr.bf16.mxu1 %v2866_v4 }
 0x6e6   :  { %2869 = vmatpush3.bf16.msra.mxu1 %v2868_v19 }
 0x6e7   :  { %2701 = vmatprep.subr.mxu1 %v2999_v45 }
 0x6e8   :  { %2837 = vmatpush1.bf16.msra.mxu0 %v2836_v61  ;;  %v1877_v61 = vld [vmem:[#allocation2 + $0x500] sm:$0xff] }
 0x6e9   :  { %2870 = vmatprep.subr.bf16.mxu0 %v2998_v44  ;;  %v2904_v63 = vpack.c.bf16 %v1878_v9, %v1877_v61 }
 0x6eb   :  { %2338 = vmatmul.mubr.msk.f32.vlgmr.msra.gmra.mrb[26].mxu0 %vm402_vm2, %v1102_v43  ;;  %v2901_v43 = vpack.c.bf16 %v1876_v62, %v1875_v3 }
 0x6ec   :  { %2698 = vmatprep.mubr.msk.f32.mxu0 %vm3001_vm4, %v2999_v45  ;;  %2872 = vmatpush3.bf16.msra.mxu0 %v2871_v60  ;;  %v2907_v60 = vpack.c.bf16 %v2031_v35, %v2030_v46 }
 0x6ed   :  { %2873 = vmatprep.subr.bf16.mxu0 %v2998_v44 }
 0x6f0   :  { %2875 = vmatpush3.bf16.msra.mxu0 %v2874_v6  ;;  %v2109_v6 = vld [vmem:[#allocation2 + $0x570] sm:$0xff] }
 0x6f1   :  { %2876 = vmatprep.subr.bf16.mxu0 %v2998_v44 }
 0x6f4   :  { %2878 = vmatpush3.bf16.msra.mxu0 %v2877_v41  ;;  %v2913_v41 = vpack.c.bf16 %v2110_v57, %v2109_v6 }
 0x6f5   :  { %2879 = vmatprep.subr.bf16.mxu0 %v2998_v44 }
 0x6f8   :  { %2881 = vmatpush3.bf16.msra.mxu0 %v2880_v25 }
 0x6f9   :  { %2882 = vmatprep.subr.bf16.mxu0 %v2998_v44 }
 0x6fc   :  { %2884 = vmatpush3.bf16.msra.mxu0 %v2883_v58 }
 0x6fd   :  { %2885 = vmatprep.subr.bf16.mxu0 %v2998_v44 }
 0x700   :  { %2887 = vmatpush3.bf16.msra.mxu0 %v2886_v54  ;;  %v2916_v54 = vpack.c.bf16 %v2112_v10, %v2111_v23 }
 0x701   :  { %2888 = vmatprep.subr.bf16.mxu0 %v2998_v44 }
 0x704   :  { %2890 = vmatpush3.bf16.msra.mxu0 %v2889_v20 }
 0x705   :  { %2891 = vmatprep.subr.bf16.mxu0 %v2998_v44 }
 0x708   :  { %2893 = vmatpush3.bf16.msra.mxu0 %v2892_v42 }
 0x709   :  { %2912 = vmatprep.subr.bf16.mxu0 %v2998_v44 }
 0x7be   :  { %v1656_v30 = vpop.f32.mrb[26].mxu0 }
 0x7bf   :  { %v1674_v21 = vadd.f32 %v1667_v17, %v1656_v30  ;;  %v1658_v16 = vpop.f32.mrb[27].mxu0  ;;  %v2189_v30 = vld [vmem:[#allocation2 + $0x5c0] sm:$0xff] }
 0x7c0   :  { %v1675_v29 = vadd.f32 %v1671_v15, %v1658_v16  ;;  %v2188_v15 = vld [vmem:[#allocation2 + $0x5b0] sm:$0xff] }
 0x7c1   :  { %v1676_v28 = vmax.f32 %v1674_v21, 0.0  ;;  %v2919_v21 = vpack.c.bf16 %v2189_v30, %v2188_v15  ;;  %v2113_v16 = vld [vmem:[%s3672_s8 + $0x10] ss:$0 sm:$0xff] }
 0x7c2   :  { %v1677_v56 = vmax.f32 %v1675_v29, 0.0 }
 0x7c4   :  { %1775 = vmatprep.mubr.f32.mxu1 %v1677_v56 }
 0x7c5   :  { %1776 = vmatmul.mubr.f32.vlgmr.msra.gmra.mrb[28].mxu1 %v1676_v28 }
 0x7c6   :  { %2703 = vmatprep.mubr.msk.f32.mxu1 %vm3001_vm4, %v2999_v45  ;;  %2702 = vmatpush3.msra.mxu1 %v1880_v11  ;;  %v2895_v45 = vpack.c.bf16 %v1872_v55, %v1871_v40 }
 0x7c7   :  { %2894 = vmatprep.subr.bf16.mxu1 %v2998_v44 }
 0x7c9   :  { %2704 = vmatmul.mubr.msk.f32.vlgmr.msra.gmra.mrb[30].mxu1 %vm1881_vm13, %v1879_v26 }
 0x7ca   :  { %2896 = vmatpush3.bf16.msra.mxu1 %v2895_v45  ;;  %2722 = vmatprep.mubr.msk.f32.mxu1 %vm3001_vm4, %v2945_v18 }
 0x7cb   :  { %2897 = vmatprep.subr.bf16.mxu1 %v2998_v44 }
 0x7ce   :  { %2899 = vmatpush3.bf16.msra.mxu1 %v2898_v49 }
 0x7cf   :  { %2900 = vmatprep.subr.bf16.mxu1 %v2998_v44 }
 0x7d2   :  { %2902 = vmatpush3.bf16.msra.mxu1 %v2901_v43 }
 0x7d3   :  { %2903 = vmatprep.subr.bf16.mxu1 %v2998_v44 }
 0x7d6   :  { %2905 = vmatpush3.bf16.msra.mxu1 %v2904_v63 }
 0x7d7   :  { %2906 = vmatprep.subr.bf16.mxu1 %v2998_v44 }
 0x898   :  { %v2461_v34 = vpop.f32.mrb[28].mxu1 }
 0x899   :  { %v2462_v14 = vpop.f32.mrb[29].mxu1 }
 0x89a   :  { %v2463_v12 = vadd.f32 %v2462_v14, %v2461_v34 }
 0x89c   :  { %v1778_v53 = vadd.f32 %v2463_v12, %v1710_v52  ;;  %v1951_v27 = vpop.f32.mrb[30].mxu1 }
 0x89d   :  { %v2705_v0 = vpop.f32.mrb[31].mxu1 }
 0x89e   :  { %v1781_v37 = vmax.f32 %v1778_v53, 0.0 }
 0x8a0   :  { %2699 = vmatmul.mubr.f32.vlgmr.msra.gmra.mrb[28].mxu0 %v1781_v37 }
 0x8a1   :  { %2744 = vmatprep.mubr.msk.f32.mxu0 %vm3001_vm4, %v2945_v18  ;;  %2914 = vmatpush3.bf16.msra.mxu0 %v2913_v41 }
 0x8a2   :  { %2915 = vmatprep.subr.bf16.mxu0 %v2998_v44 }
 0x8a5   :  { %2917 = vmatpush3.bf16.msra.mxu0 %v2916_v54 }
 0x973   :  { %v1865_v1 = vpop.f32.mrb[28].mxu0 }
 0x974   :  { %v1866_v4 = vadd.f32 %v1865_v1, %v1798_v39  ;;  %v2700_v2 = vpop.f32.mrb[29].mxu0 }
 0x976   :  { %v1869_v19 = vmax.f32 %v1866_v4, 0.0 }
 0x978   :  { %2723 = vmatmul.mubr.msk.f32.vlgmr.msra.gmra.mrb[32].mxu1 %vm173_vm8, %v1869_v19  ;;  %vm2270_vm8 = vcmask 269568  }
 0x979   :  { %2733 = vmatprep.mubr.msk.f32.mxu1 %vm3001_vm4, %v2945_v18  ;;  %2908 = vmatpush3.bf16.msra.mxu1 %v2907_v60 }
 0x97a   :  { %2909 = vmatprep.subr.bf16.mxu1 %v2998_v44 }
 0x97d   :  { %2911 = vmatpush3.bf16.msra.mxu1 %v2910_v38 }
 0x97e   :  { %2918 = vmatprep.subr.bf16.mxu1 %v2998_v44  ;;  %v2034_v44 = vld [vmem:[%s3672_s8 + $0x7] ss:$0 sm:$0xff] }
 0xa4b   :  { %v2024_v24 = vpop.f32.mrb[32].mxu1 }
 0xa4c   :  { %v2025_v25 = vadd.f32 %v2024_v24, %v1951_v27  ;;  %v2724_v36 = vpop.f32.mrb[33].mxu1 }
 0xa4e   :  { %v2028_v51 = vadd.f32 %v2025_v25, %v1870_v31 }
 0xa50   :  { %v2029_v58 = vmax.f32 %v2028_v51, 0.0  ;;  %2265 = vst.msk [vmem:[#allocation5] sm:$0xff] %vm402_vm2, %v2028_v51 }
 0xa52   :  { %2734 = vmatmul.mubr.msk.f32.vlgmr.msra.gmra.mrb[34].mxu1 %vm402_vm2, %v2029_v58 }
 0xa53   :  { %2751 = vmatprep.mubr.msk.f32.mxu1 %vm3001_vm4, %v2945_v18  ;;  %2920 = vmatpush3.bf16.msra.mxu1 %v2919_v21 }
 0xb25   :  { %v2104_v32 = vpop.f32.mrb[34].mxu1 }
 0xb26   :  { %v2105_v33 = vadd.f32 %v2104_v32, %v2034_v44  ;;  %v2735_v48 = vpop.f32.mrb[35].mxu1 }
 0xb28   :  { %v2108_v17 = vmax.f32 %v2105_v33, 0.0 }
 0xb2a   :  { %2745 = vmatmul.mubr.msk.f32.vlgmr.msra.gmra.mrb[30].mxu0 %vm402_vm2, %v2108_v17 }
 0xbfd   :  { %v2183_v29 = vpop.f32.mrb[30].mxu0 }
 0xbfe   :  { %v2184_v56 = vadd.f32 %v2183_v29, %v2113_v16  ;;  %v2746_v28 = vpop.f32.mrb[31].mxu0 }
 0xc00   :  { %v2187_v8 = vmax.f32 %v2184_v56, 0.0 }
 0xc02   :  { %2752 = vmatmul.mubr.msk.f32.vlgmr.msra.gmra.mrb[36].mxu1 %vm259_vm1, %v2187_v8 }
 0xcd5   :  { %v2260_v7 = vpop.f32.mrb[36].mxu1 }
 0xcd6   :  { %v2261_v20 = vadd.f32 %v2260_v7, %v2190_v5  ;;  %v2753_v22 = vpop.f32.mrb[37].mxu1 }
 0xcd8   :  { %2267 = vrot.lane.b32.xlu1 %v2261_v20, %s3002_s2 }
 0xd4a   :  { %v2268_v11 = vpop.permute.xlu1 %2267 }
 0xd4b   :  { %2271 = vst.msk [vmem:[#allocation5] sm:$0xff] %vm2270_vm8, %v2268_v11 }
 0xd4c   :  { %2979 = shalt.err (!%p2976_p12)
}
 0xd4d   :  { %s2980_s0 = scalar_lea.hbm %s3673_s9, 128 }
 0xd4e   :  { %p2981_p13 = scmp.ne.s32.totalorder %s3673_s9, %s2980_s0  ;;  %p2984_p0 = scmp.lt.u32.totalorder %s2980_s0, %s3673_s9 }
 0xd50   :  { %p2986_p1 = pnand %p2984_p0, %p2981_p13 }
 0xd52   :  { %2989 = shalt.err (!%p2986_p1)
}
 0xd53   :  { %2281 = dma.vmem_to_hbm [thread:$0]  %s2279_s30, 128, %s3673_s9, [#allocation4]  }
 0xd54   :  { %2992 = dma.done.wait [#allocation4], 128  }
 0xd55   :  { %2993 = vsyncadd [#allocation4], 4294967168 }
 0xd56   :  { %2285 = vsyncpa [#allocation3], 1 }
 0xd57   :  { %2286 = vsyncpa [#allocation4], 1 }

</bundles_post_ra>
